<compile_context>
chip_gen: v6e
topology: v6e:2x2x1
jax: 0.10.0
libtpu: 0.0.40
codegen_flags: <defaults>
</compile_context>

<pallas_src>
import functools
import math

import jax
import jax.numpy as jnp
from jax import lax
from jax.experimental import pallas as pl
from jax.experimental.pallas import tpu as pltpu

# ---- module config (small Longformer config consistent with MyLongformerBlock) ----
HIDDEN = 32
NUM_HEADS = 4
HEAD_DIM = HIDDEN // NUM_HEADS
WINDOW = 8                 # attention_window[0]; sliding_chunks: attend WINDOW each side
FFN_HIDDEN = 4 * HIDDEN
LN_EPS = 1e-5              # PyTorch LayerNorm default
NEG_INF = -1e30            # plain python float (kernel must not capture jnp constants)


def _longformer_block_kernel(x_ref, wqkv_ref, w1_ref, w2_ref, vec_ref, out_ref,
                             *, S, TQ, SPAN, W, H, NH, HD, FFN, SINGLE_TILE):
    """One (batch item, query tile) step of the fused Longformer block.

    x_ref   : (S, H)        full sequence of this batch item (keys/values + residual source)
    wqkv_ref: (H, 3H)       fused q|k|v weights, q part pre-scaled by 1/sqrt(HD)
    w1_ref  : (H, FFN), w2_ref: (FFN, H)
    vec_ref : (8, 128)      packed small params: row0 = bq|bk|bv, row1 = b1, row2 = b2,
                            row3 = g1, row4 = be1, row5 = g2, row6 = be2
    out_ref : (TQ, H)
    """
    # ---- packed small params (single lane-dense (8,128) tile -> one DMA) ----
    b_qkv = vec_ref[0:1, :3 * H]
    b_1   = vec_ref[1:2, :FFN]
    b_2   = vec_ref[2:3, :H]
    g_1   = vec_ref[3:4, :H]
    be_1  = vec_ref[4:5, :H]
    g_2   = vec_ref[5:6, :H]
    be_2  = vec_ref[6:7, :H]

    if SINGLE_TILE:
        # One tile covers the whole sequence: project the window ONCE and take q as a
        # static slice of the shared projection (review item: drop the separate q matmul).
        q0 = 0
        start = 0
        x_win = x_ref[...]                                   # (S, H) == (SPAN, H)
        x_q = x_win
        proj = jnp.dot(x_win, wqkv_ref[...],
                       preferred_element_type=jnp.float32) + b_qkv   # (SPAN, 3H)
        q = proj[:, :H]
        k = proj[:, H:2 * H]
        v = proj[:, 2 * H:3 * H]
    else:
        # Generic banded path (nq > 1): per-tile key window of SPAN = TQ + 2W rows.
        qi = pl.program_id(1)
        q0 = pl.multiple_of(qi * TQ, 8)                      # first query row of this tile
        start = pl.multiple_of(jnp.clip(q0 - W, 0, S - SPAN), 8)
        x_win = x_ref[pl.ds(start, SPAN), :]                 # (SPAN, H)
        x_q = x_ref[pl.ds(q0, TQ), :]                        # (TQ, H)
        q = jnp.dot(x_q, wqkv_ref[:, :H],
                    preferred_element_type=jnp.float32) + b_qkv[:, :H]
        kv = jnp.dot(x_win, wqkv_ref[:, H:3 * H],
                     preferred_element_type=jnp.float32) + b_qkv[:, H:3 * H]
        k = kv[:, :H]
        v = kv[:, H:2 * H]

    NHSPAN = NH * SPAN

    # ---- head-packed block-diagonal operands, built in registers (no transposes, no
    #      VMEM scratch): column block h of K'/V' is k/v masked to head-h lanes. ----
    lane = lax.broadcasted_iota(jnp.int32, (SPAN, H), 1)
    k_bd = jnp.concatenate(
        [jnp.where((lane >= h * HD) & (lane < (h + 1) * HD), k, 0.0) for h in range(NH)],
        axis=0)                                              # (NH*SPAN, H) block-diagonal
    v_bd = jnp.concatenate(
        [jnp.where((lane >= h * HD) & (lane < (h + 1) * HD), v, 0.0) for h in range(NH)],
        axis=0)                                              # (NH*SPAN, H) block-diagonal

    # ---- one packed QK matmul: (TQ,H) x (NH*SPAN,H)^T -> lane-dense (TQ, NH*SPAN) ----
    s = lax.dot_general(q, k_bd, (((1,), (1,)), ((), ())),
                        preferred_element_type=jnp.float32)

    # ---- band mask built in-kernel from the same start/q0 scalars (no mask DMA) ----
    kiota = lax.broadcasted_iota(jnp.int32, (TQ, SPAN), 1)
    key_abs = start + jnp.concatenate([kiota] * NH, axis=1)  # (TQ, NH*SPAN)
    q_abs = q0 + lax.broadcasted_iota(jnp.int32, (TQ, NHSPAN), 0)
    band = jnp.abs(q_abs - key_abs) <= W
    s = jnp.where(band, s, NEG_INF)

    # ---- per-head softmax as static lane slices of the packed score tile ----
    m = jnp.concatenate(
        [jnp.broadcast_to(jnp.max(s[:, h * SPAN:(h + 1) * SPAN], axis=-1, keepdims=True),
                          (TQ, SPAN)) for h in range(NH)], axis=1)
    p = jnp.exp(s - m)                                       # (TQ, NH*SPAN)
    l = jnp.concatenate(
        [jnp.broadcast_to(jnp.sum(p[:, h * SPAN:(h + 1) * SPAN], axis=-1, keepdims=True),
                          (TQ, HD)) for h in range(NH)], axis=1)   # (TQ, H)

    # ---- one packed PV matmul: output is already the concatenated (TQ, H) head output ----
    o = jnp.dot(p, v_bd, preferred_element_type=jnp.float32)
    attn = o / l          # exact division (correctness-review note on approx reciprocal)
    # TODO(synk): attention/FFN dropout is identity in eval mode (training=False); omitted.
    # The *_global projections of LongformerSelfAttention are never used in forward().

    # ---- residual + LayerNorm1 ----
    x1 = x_q + attn
    mu = jnp.mean(x1, axis=-1, keepdims=True)
    var = jnp.mean((x1 - mu) ** 2, axis=-1, keepdims=True)
    x1 = (x1 - mu) * lax.rsqrt(var + LN_EPS) * g_1 + be_1

    # ---- FFN: Linear(H,4H) -> ReLU -> Linear(4H,H) ----
    hdd = jnp.maximum(jnp.dot(x1, w1_ref[...], preferred_element_type=jnp.float32) + b_1, 0.0)
    ffn = jnp.dot(hdd, w2_ref[...], preferred_element_type=jnp.float32) + b_2

    # ---- residual + LayerNorm2 ----
    x2 = x1 + ffn
    mu2 = jnp.mean(x2, axis=-1, keepdims=True)
    var2 = jnp.mean((x2 - mu2) ** 2, axis=-1, keepdims=True)
    out_ref[...] = (x2 - mu2) * lax.rsqrt(var2 + LN_EPS) * g_2 + be_2


def _pick_tq(S):
    # Whole sequence in one tile whenever reasonable (amortizes the ~0.35 us/step overhead);
    # cap the tile for long sequences to bound the packed (TQ, NH*SPAN) score footprint.
    if S <= 256:
        return S
    for cand in (256, 128, 64, 32, 16, 8):
        if S % cand == 0:
            return cand
    return S


def my_longformer_block(x, params, *, tq=None):
    B, S, H = x.shape
    W = WINDOW
    assert H == HIDDEN
    assert S % (2 * W) == 0, "sliding_chunks requires seq_len % (2*attention_window) == 0"
    if tq is None:
        tq = _pick_tq(S)
    assert W % 8 == 0 and tq % 8 == 0 and S % tq == 0
    span = min(S, tq + 2 * W)          # key window width per query tile
    nq = S // tq                       # grid=(B, nq): B>=2 keeps both v7x TCs busy even at nq=1

    # ---- fold / pack parameters (outside the kernel, once per call) ----
    scale = 1.0 / math.sqrt(HEAD_DIM)
    wqkv = jnp.concatenate(
        [params['wq'] * scale, params['wk'], params['wv']], axis=1)      # (H, 3H)

    vec = jnp.zeros((8, 128), jnp.float32)
    vec = vec.at[0, :H].set(params['bq'][0] * scale)
    vec = vec.at[0, H:2 * H].set(params['bk'][0])
    vec = vec.at[0, 2 * H:3 * H].set(params['bv'][0])
    vec = vec.at[1, :FFN_HIDDEN].set(params['b1'][0])
    vec = vec.at[2, :H].set(params['b2'][0])
    vec = vec.at[3, :H].set(params['g1'][0])
    vec = vec.at[4, :H].set(params['be1'][0])
    vec = vec.at[5, :H].set(params['g2'][0])
    vec = vec.at[6, :H].set(params['be2'][0])

    kernel = functools.partial(
        _longformer_block_kernel,
        S=S, TQ=tq, SPAN=span, W=W, H=H, NH=NUM_HEADS, HD=HEAD_DIM, FFN=FFN_HIDDEN,
        SINGLE_TILE=(nq == 1))

    return pl.pallas_call(
        kernel,
        out_shape=jax.ShapeDtypeStruct((B, S, H), jnp.float32),
        grid_spec=pltpu.PrefetchScalarGridSpec(
            num_scalar_prefetch=0,
            grid=(B, nq),
            in_specs=[
                pl.BlockSpec((None, S, H), lambda b, qi: (b, 0, 0)),      # x (full seq / batch)
                pl.BlockSpec((H, 3 * H), lambda b, qi: (0, 0)),           # fused wqkv
                pl.BlockSpec((H, FFN_HIDDEN), lambda b, qi: (0, 0)),      # w1
                pl.BlockSpec((FFN_HIDDEN, H), lambda b, qi: (0, 0)),      # w2
                pl.BlockSpec((8, 128), lambda b, qi: (0, 0)),             # packed small params
            ],
            out_specs=pl.BlockSpec((None, tq, H), lambda b, qi: (b, qi, 0)),
        ),
        compiler_params=pltpu.CompilerParams(
            dimension_semantics=("parallel", "parallel")),
    )(x, wqkv, params['w1'], params['w2'], vec)


def reference_block(x, params):
    """Pure-JAX reference: dense attention with the |i-j| <= WINDOW band mask."""
    B, S, H = x.shape
    q = x @ params['wq'] + params['bq'][0]
    k = x @ params['wk'] + params['bk'][0]
    v = x @ params['wv'] + params['bv'][0]
    q = q / math.sqrt(HEAD_DIM)
    qh = q.reshape(B, S, NUM_HEADS, HEAD_DIM).transpose(0, 2, 1, 3)
    kh = k.reshape(B, S, NUM_HEADS, HEAD_DIM).transpose(0, 2, 1, 3)
    vh = v.reshape(B, S, NUM_HEADS, HEAD_DIM).transpose(0, 2, 1, 3)
    s = jnp.einsum('bnid,bnjd->bnij', qh, kh)
    i_idx = jnp.arange(S)[:, None]
    j_idx = jnp.arange(S)[None, :]
    band = jnp.abs(i_idx - j_idx) <= WINDOW
    s = jnp.where(band[None, None], s, NEG_INF)
    probs = jax.nn.softmax(s, axis=-1)
    attn = jnp.einsum('bnij,bnjd->bnid', probs, vh)
    attn_out = attn.transpose(0, 2, 1, 3).reshape(B, S, H)

    def layernorm(t, g, b):
        mu = jnp.mean(t, axis=-1, keepdims=True)
        var = jnp.mean((t - mu) ** 2, axis=-1, keepdims=True)
        return (t - mu) / jnp.sqrt(var + LN_EPS) * g[0] + b[0]

    x1 = layernorm(x + attn_out, params['g1'], params['be1'])
    ffn = jnp.maximum(x1 @ params['w1'] + params['b1'][0], 0.0) @ params['w2'] + params['b2'][0]
    return layernorm(x1 + ffn, params['g2'], params['be2'])


def init_params(key):
    ks = jax.random.split(key, 14)
    s = 0.02
    return {
        # projection weights stored pre-transposed: (in, out)
        'wq': s * jax.random.normal(ks[0], (HIDDEN, HIDDEN), jnp.float32),
        'bq': s * jax.random.normal(ks[1], (1, HIDDEN), jnp.float32),
        'wk': s * jax.random.normal(ks[2], (HIDDEN, HIDDEN), jnp.float32),
        'bk': s * jax.random.normal(ks[3], (1, HIDDEN), jnp.float32),
        'wv': s * jax.random.normal(ks[4], (HIDDEN, HIDDEN), jnp.float32),
        'bv': s * jax.random.normal(ks[5], (1, HIDDEN), jnp.float32),
        'w1': s * jax.random.normal(ks[6], (HIDDEN, FFN_HIDDEN), jnp.float32),
        'b1': s * jax.random.normal(ks[7], (1, FFN_HIDDEN), jnp.float32),
        'w2': s * jax.random.normal(ks[8], (FFN_HIDDEN, HIDDEN), jnp.float32),
        'b2': s * jax.random.normal(ks[9], (1, HIDDEN), jnp.float32),
        # LayerNorm params (randomized around the PyTorch default init to exercise packing)
        'g1': 1.0 + 0.1 * jax.random.normal(ks[10], (1, HIDDEN), jnp.float32),
        'be1': 0.1 * jax.random.normal(ks[11], (1, HIDDEN), jnp.float32),
        'g2': 1.0 + 0.1 * jax.random.normal(ks[12], (1, HIDDEN), jnp.float32),
        'be2': 0.1 * jax.random.normal(ks[13], (1, HIDDEN), jnp.float32),
    }


if __name__ == "__main__":
    key = jax.random.PRNGKey(0)
    k_x, k_p = jax.random.split(key)
    B, S = 2, 48                     # S multiple of 2*WINDOW = 16
    x = jax.random.normal(k_x, (B, S, HIDDEN), jnp.float32)
    params = init_params(k_p)

    ref = reference_block(x, params)

    # Primary path: one query tile per batch item -> grid=(B, 1), both axes parallel.
    out = jax.block_until_ready(my_longformer_block(x, params))
    assert out.shape == (B, S, HIDDEN)
    err = float(jnp.max(jnp.abs(out - ref)))
    assert jnp.allclose(out, ref, rtol=3e-3, atol=3e-3), f"single-tile mismatch (max err {err})"

    # Generic banded multi-tile path (tq < S): same semantics, per-tile key window.
    out_tiled = jax.block_until_ready(my_longformer_block(x, params, tq=16))
    err_t = float(jnp.max(jnp.abs(out_tiled - ref)))
    assert jnp.allclose(out_tiled, ref, rtol=3e-3, atol=3e-3), f"tiled mismatch (max err {err_t})"

    print("KERNEL_OK")
</pallas_src>

<mosaic_0001>
module attributes {stable_mosaic.version = 11 : i64} {
  func.func @_longformer_block_kernel(%arg0: i32, %arg1: i32, %arg2: memref<1x48x32xf32, #tpu.memory_space<vmem>>, %arg3: memref<32x96xf32, #tpu.memory_space<vmem>>, %arg4: memref<32x128xf32, #tpu.memory_space<vmem>>, %arg5: memref<128x32xf32, #tpu.memory_space<vmem>>, %arg6: memref<8x128xf32, #tpu.memory_space<vmem>>, %arg7: memref<1x48x32xf32, #tpu.memory_space<vmem>>) attributes {dimension_semantics = [#tpu.dimension_semantics<parallel>, #tpu.dimension_semantics<parallel>], iteration_bounds = array<i64: 2, 1>, scalar_prefetch = 0 : i64, scratch_operands = 0 : i64, tpu.core_type = #tpu.core_type<tc>, window_params = [{transform_indices = @transform_0, window_bounds = array<i64: 1, 48, 32>}, {pipeline_mode = #tpu.pipeline_mode<synchronous>, transform_indices = @transform_1, window_bounds = array<i64: 32, 96>}, {pipeline_mode = #tpu.pipeline_mode<synchronous>, transform_indices = @transform_2, window_bounds = array<i64: 32, 128>}, {pipeline_mode = #tpu.pipeline_mode<synchronous>, transform_indices = @transform_3, window_bounds = array<i64: 128, 32>}, {pipeline_mode = #tpu.pipeline_mode<synchronous>, transform_indices = @transform_4, window_bounds = array<i64: 8, 128>}, {transform_indices = @transform_5, window_bounds = array<i64: 1, 48, 32>}]} {
    %c0 = arith.constant 0 : index
    %c0_0 = arith.constant 0 : index
    %0 = vector.load %arg6[%c0, %c0_0] : memref<8x128xf32, #tpu.memory_space<vmem>>, vector<1x96xf32>
    %c1 = arith.constant 1 : index
    %c0_1 = arith.constant 0 : index
    %1 = vector.load %arg6[%c1, %c0_1] : memref<8x128xf32, #tpu.memory_space<vmem>>, vector<1x128xf32>
    %c2 = arith.constant 2 : index
    %c0_2 = arith.constant 0 : index
    %2 = vector.load %arg6[%c2, %c0_2] : memref<8x128xf32, #tpu.memory_space<vmem>>, vector<1x32xf32>
    %c3 = arith.constant 3 : index
    %c0_3 = arith.constant 0 : index
    %3 = vector.load %arg6[%c3, %c0_3] : memref<8x128xf32, #tpu.memory_space<vmem>>, vector<1x32xf32>
    %c4 = arith.constant 4 : index
    %c0_4 = arith.constant 0 : index
    %4 = vector.load %arg6[%c4, %c0_4] : memref<8x128xf32, #tpu.memory_space<vmem>>, vector<1x32xf32>
    %c5 = arith.constant 5 : index
    %c0_5 = arith.constant 0 : index
    %5 = vector.load %arg6[%c5, %c0_5] : memref<8x128xf32, #tpu.memory_space<vmem>>, vector<1x32xf32>
    %c6 = arith.constant 6 : index
    %c0_6 = arith.constant 0 : index
    %6 = vector.load %arg6[%c6, %c0_6] : memref<8x128xf32, #tpu.memory_space<vmem>>, vector<1x32xf32>
    %c0_7 = arith.constant 0 : index
    %c0_8 = arith.constant 0 : index
    %c0_9 = arith.constant 0 : index
    %7 = vector.load %arg2[%c0_7, %c0_8, %c0_9] : memref<1x48x32xf32, #tpu.memory_space<vmem>>, vector<1x48x32xf32>
    %8 = vector.shape_cast %7 : vector<1x48x32xf32> to vector<48x32xf32>
    %c0_10 = arith.constant 0 : index
    %c0_11 = arith.constant 0 : index
    %9 = vector.load %arg3[%c0_10, %c0_11] : memref<32x96xf32, #tpu.memory_space<vmem>>, vector<32x96xf32>
    %cst = arith.constant dense<0.000000e+00> : vector<48x96xf32>
    %10 = tpu.matmul %8, %9, %cst {dimension_numbers = #tpu.dot_dimension_numbers<[1], [0], [0], [1], [0, 0, 1, 1], [], []>} : vector<48x32xf32>, vector<32x96xf32>, vector<48x96xf32> -> vector<48x96xf32>
    %11 = vector.broadcast %0 : vector<1x96xf32> to vector<48x96xf32>
    %12 = arith.addf %10, %11 : vector<48x96xf32>
    %13 = vector.extract_strided_slice %12 {offsets = [0, 0], sizes = [48, 32], strides = [1, 1]} : vector<48x96xf32> to vector<48x32xf32>
    %14 = vector.extract_strided_slice %12 {offsets = [0, 32], sizes = [48, 32], strides = [1, 1]} : vector<48x96xf32> to vector<48x32xf32>
    %15 = vector.extract_strided_slice %12 {offsets = [0, 64], sizes = [48, 32], strides = [1, 1]} : vector<48x96xf32> to vector<48x32xf32>
    %16 = tpu.iota {dimensions = array<i32: 1>} : vector<48x32xi32>
    %c0_i32 = arith.constant 0 : i32
    %17 = vector.broadcast %c0_i32 : i32 to vector<48x32xi32>
    %18 = arith.cmpi sge, %16, %17 : vector<48x32xi32>
    %c8_i32 = arith.constant 8 : i32
    %19 = vector.broadcast %c8_i32 : i32 to vector<48x32xi32>
    %20 = arith.cmpi slt, %16, %19 : vector<48x32xi32>
    %21 = arith.andi %18, %20 : vector<48x32xi1>
    %cst_12 = arith.constant 0.000000e+00 : f32
    %22 = vector.broadcast %cst_12 : f32 to vector<48x32xf32>
    %23 = arith.select %21, %14, %22 : vector<48x32xi1>, vector<48x32xf32>
    %c8_i32_13 = arith.constant 8 : i32
    %24 = vector.broadcast %c8_i32_13 : i32 to vector<48x32xi32>
    %25 = arith.cmpi sge, %16, %24 : vector<48x32xi32>
    %c16_i32 = arith.constant 16 : i32
    %26 = vector.broadcast %c16_i32 : i32 to vector<48x32xi32>
    %27 = arith.cmpi slt, %16, %26 : vector<48x32xi32>
    %28 = arith.andi %25, %27 : vector<48x32xi1>
    %cst_14 = arith.constant 0.000000e+00 : f32
    %29 = vector.broadcast %cst_14 : f32 to vector<48x32xf32>
    %30 = arith.select %28, %14, %29 : vector<48x32xi1>, vector<48x32xf32>
    %c16_i32_15 = arith.constant 16 : i32
    %31 = vector.broadcast %c16_i32_15 : i32 to vector<48x32xi32>
    %32 = arith.cmpi sge, %16, %31 : vector<48x32xi32>
    %c24_i32 = arith.constant 24 : i32
    %33 = vector.broadcast %c24_i32 : i32 to vector<48x32xi32>
    %34 = arith.cmpi slt, %16, %33 : vector<48x32xi32>
    %35 = arith.andi %32, %34 : vector<48x32xi1>
    %cst_16 = arith.constant 0.000000e+00 : f32
    %36 = vector.broadcast %cst_16 : f32 to vector<48x32xf32>
    %37 = arith.select %35, %14, %36 : vector<48x32xi1>, vector<48x32xf32>
    %c24_i32_17 = arith.constant 24 : i32
    %38 = vector.broadcast %c24_i32_17 : i32 to vector<48x32xi32>
    %39 = arith.cmpi sge, %16, %38 : vector<48x32xi32>
    %c32_i32 = arith.constant 32 : i32
    %40 = vector.broadcast %c32_i32 : i32 to vector<48x32xi32>
    %41 = arith.cmpi slt, %16, %40 : vector<48x32xi32>
    %42 = arith.andi %39, %41 : vector<48x32xi1>
    %cst_18 = arith.constant 0.000000e+00 : f32
    %43 = vector.broadcast %cst_18 : f32 to vector<48x32xf32>
    %44 = arith.select %42, %14, %43 : vector<48x32xi1>, vector<48x32xf32>
    %45 = tpu.concatenate %23, %30, %37, %44 in 0 : vector<48x32xf32>, vector<48x32xf32>, vector<48x32xf32>, vector<48x32xf32> -> vector<192x32xf32>
    %c0_i32_19 = arith.constant 0 : i32
    %46 = vector.broadcast %c0_i32_19 : i32 to vector<48x32xi32>
    %47 = arith.cmpi sge, %16, %46 : vector<48x32xi32>
    %c8_i32_20 = arith.constant 8 : i32
    %48 = vector.broadcast %c8_i32_20 : i32 to vector<48x32xi32>
    %49 = arith.cmpi slt, %16, %48 : vector<48x32xi32>
    %50 = arith.andi %47, %49 : vector<48x32xi1>
    %cst_21 = arith.constant 0.000000e+00 : f32
    %51 = vector.broadcast %cst_21 : f32 to vector<48x32xf32>
    %52 = arith.select %50, %15, %51 : vector<48x32xi1>, vector<48x32xf32>
    %c8_i32_22 = arith.constant 8 : i32
    %53 = vector.broadcast %c8_i32_22 : i32 to vector<48x32xi32>
    %54 = arith.cmpi sge, %16, %53 : vector<48x32xi32>
    %c16_i32_23 = arith.constant 16 : i32
    %55 = vector.broadcast %c16_i32_23 : i32 to vector<48x32xi32>
    %56 = arith.cmpi slt, %16, %55 : vector<48x32xi32>
    %57 = arith.andi %54, %56 : vector<48x32xi1>
    %cst_24 = arith.constant 0.000000e+00 : f32
    %58 = vector.broadcast %cst_24 : f32 to vector<48x32xf32>
    %59 = arith.select %57, %15, %58 : vector<48x32xi1>, vector<48x32xf32>
    %c16_i32_25 = arith.constant 16 : i32
    %60 = vector.broadcast %c16_i32_25 : i32 to vector<48x32xi32>
    %61 = arith.cmpi sge, %16, %60 : vector<48x32xi32>
    %c24_i32_26 = arith.constant 24 : i32
    %62 = vector.broadcast %c24_i32_26 : i32 to vector<48x32xi32>
    %63 = arith.cmpi slt, %16, %62 : vector<48x32xi32>
    %64 = arith.andi %61, %63 : vector<48x32xi1>
    %cst_27 = arith.constant 0.000000e+00 : f32
    %65 = vector.broadcast %cst_27 : f32 to vector<48x32xf32>
    %66 = arith.select %64, %15, %65 : vector<48x32xi1>, vector<48x32xf32>
    %c24_i32_28 = arith.constant 24 : i32
    %67 = vector.broadcast %c24_i32_28 : i32 to vector<48x32xi32>
    %68 = arith.cmpi sge, %16, %67 : vector<48x32xi32>
    %c32_i32_29 = arith.constant 32 : i32
    %69 = vector.broadcast %c32_i32_29 : i32 to vector<48x32xi32>
    %70 = arith.cmpi slt, %16, %69 : vector<48x32xi32>
    %71 = arith.andi %68, %70 : vector<48x32xi1>
    %cst_30 = arith.constant 0.000000e+00 : f32
    %72 = vector.broadcast %cst_30 : f32 to vector<48x32xf32>
    %73 = arith.select %71, %15, %72 : vector<48x32xi1>, vector<48x32xf32>
    %74 = tpu.concatenate %52, %59, %66, %73 in 0 : vector<48x32xf32>, vector<48x32xf32>, vector<48x32xf32>, vector<48x32xf32> -> vector<192x32xf32>
    %cst_31 = arith.constant dense<0.000000e+00> : vector<48x192xf32>
    %75 = tpu.matmul %13, %45, %cst_31 {dimension_numbers = #tpu.dot_dimension_numbers<[1], [1], [0], [0], [0, 0, 1, 0], [], []>} : vector<48x32xf32>, vector<192x32xf32>, vector<48x192xf32> -> vector<48x192xf32>
    %76 = tpu.iota {dimensions = array<i32: 1>} : vector<48x48xi32>
    %77 = tpu.concatenate %76, %76, %76, %76 in 1 : vector<48x48xi32>, vector<48x48xi32>, vector<48x48xi32>, vector<48x48xi32> -> vector<48x192xi32>
    %c0_i32_32 = arith.constant 0 : i32
    %78 = vector.broadcast %c0_i32_32 : i32 to vector<48x192xi32>
    %79 = arith.addi %78, %77 : vector<48x192xi32>
    %80 = tpu.iota {dimensions = array<i32: 0>} : vector<48x192xi32>
    %c0_i32_33 = arith.constant 0 : i32
    %81 = vector.broadcast %c0_i32_33 : i32 to vector<48x192xi32>
    %82 = arith.addi %81, %80 : vector<48x192xi32>
    %83 = arith.subi %82, %79 : vector<48x192xi32>
    %84 = math.absi %83 : vector<48x192xi32>
    %c8_i32_34 = arith.constant 8 : i32
    %85 = vector.broadcast %c8_i32_34 : i32 to vector<48x192xi32>
    %86 = arith.cmpi sle, %84, %85 : vector<48x192xi32>
    %cst_35 = arith.constant -1.000000e+30 : f32
    %87 = vector.broadcast %cst_35 : f32 to vector<48x192xf32>
    %88 = arith.select %86, %75, %87 : vector<48x192xi1>, vector<48x192xf32>
    %89 = vector.extract_strided_slice %88 {offsets = [0, 0], sizes = [48, 48], strides = [1, 1]} : vector<48x192xf32> to vector<48x48xf32>
    %cst_36 = arith.constant dense<0xFF800000> : vector<48xf32>
    %90 = vector.multi_reduction <maximumf>, %89, %cst_36 [1] : vector<48x48xf32> to vector<48xf32>
    %91 = vector.shape_cast %90 : vector<48xf32> to vector<48x1xf32>
    %92 = vector.shape_cast %91 : vector<48x1xf32> to vector<48x1xf32>
    %93 = vector.broadcast %92 : vector<48x1xf32> to vector<48x48xf32>
    %94 = vector.extract_strided_slice %88 {offsets = [0, 48], sizes = [48, 48], strides = [1, 1]} : vector<48x192xf32> to vector<48x48xf32>
    %cst_37 = arith.constant dense<0xFF800000> : vector<48xf32>
    %95 = vector.multi_reduction <maximumf>, %94, %cst_37 [1] : vector<48x48xf32> to vector<48xf32>
    %96 = vector.shape_cast %95 : vector<48xf32> to vector<48x1xf32>
    %97 = vector.shape_cast %96 : vector<48x1xf32> to vector<48x1xf32>
    %98 = vector.broadcast %97 : vector<48x1xf32> to vector<48x48xf32>
    %99 = vector.extract_strided_slice %88 {offsets = [0, 96], sizes = [48, 48], strides = [1, 1]} : vector<48x192xf32> to vector<48x48xf32>
    %cst_38 = arith.constant dense<0xFF800000> : vector<48xf32>
    %100 = vector.multi_reduction <maximumf>, %99, %cst_38 [1] : vector<48x48xf32> to vector<48xf32>
    %101 = vector.shape_cast %100 : vector<48xf32> to vector<48x1xf32>
    %102 = vector.shape_cast %101 : vector<48x1xf32> to vector<48x1xf32>
    %103 = vector.broadcast %102 : vector<48x1xf32> to vector<48x48xf32>
    %104 = vector.extract_strided_slice %88 {offsets = [0, 144], sizes = [48, 48], strides = [1, 1]} : vector<48x192xf32> to vector<48x48xf32>
    %cst_39 = arith.constant dense<0xFF800000> : vector<48xf32>
    %105 = vector.multi_reduction <maximumf>, %104, %cst_39 [1] : vector<48x48xf32> to vector<48xf32>
    %106 = vector.shape_cast %105 : vector<48xf32> to vector<48x1xf32>
    %107 = vector.shape_cast %106 : vector<48x1xf32> to vector<48x1xf32>
    %108 = vector.broadcast %107 : vector<48x1xf32> to vector<48x48xf32>
    %109 = tpu.concatenate %93, %98, %103, %108 in 1 : vector<48x48xf32>, vector<48x48xf32>, vector<48x48xf32>, vector<48x48xf32> -> vector<48x192xf32>
    %110 = arith.subf %88, %109 : vector<48x192xf32>
    %111 = math.exp %110 : vector<48x192xf32>
    %112 = vector.extract_strided_slice %111 {offsets = [0, 0], sizes = [48, 48], strides = [1, 1]} : vector<48x192xf32> to vector<48x48xf32>
    %cst_40 = arith.constant dense<0.000000e+00> : vector<48xf32>
    %113 = vector.multi_reduction <add>, %112, %cst_40 [1] : vector<48x48xf32> to vector<48xf32>
    %114 = vector.shape_cast %113 : vector<48xf32> to vector<48x1xf32>
    %115 = vector.shape_cast %114 : vector<48x1xf32> to vector<48x1xf32>
    %116 = vector.broadcast %115 : vector<48x1xf32> to vector<48x8xf32>
    %117 = vector.extract_strided_slice %111 {offsets = [0, 48], sizes = [48, 48], strides = [1, 1]} : vector<48x192xf32> to vector<48x48xf32>
    %cst_41 = arith.constant dense<0.000000e+00> : vector<48xf32>
    %118 = vector.multi_reduction <add>, %117, %cst_41 [1] : vector<48x48xf32> to vector<48xf32>
    %119 = vector.shape_cast %118 : vector<48xf32> to vector<48x1xf32>
    %120 = vector.shape_cast %119 : vector<48x1xf32> to vector<48x1xf32>
    %121 = vector.broadcast %120 : vector<48x1xf32> to vector<48x8xf32>
    %122 = vector.extract_strided_slice %111 {offsets = [0, 96], sizes = [48, 48], strides = [1, 1]} : vector<48x192xf32> to vector<48x48xf32>
    %cst_42 = arith.constant dense<0.000000e+00> : vector<48xf32>
    %123 = vector.multi_reduction <add>, %122, %cst_42 [1] : vector<48x48xf32> to vector<48xf32>
    %124 = vector.shape_cast %123 : vector<48xf32> to vector<48x1xf32>
    %125 = vector.shape_cast %124 : vector<48x1xf32> to vector<48x1xf32>
    %126 = vector.broadcast %125 : vector<48x1xf32> to vector<48x8xf32>
    %127 = vector.extract_strided_slice %111 {offsets = [0, 144], sizes = [48, 48], strides = [1, 1]} : vector<48x192xf32> to vector<48x48xf32>
    %cst_43 = arith.constant dense<0.000000e+00> : vector<48xf32>
    %128 = vector.multi_reduction <add>, %127, %cst_43 [1] : vector<48x48xf32> to vector<48xf32>
    %129 = vector.shape_cast %128 : vector<48xf32> to vector<48x1xf32>
    %130 = vector.shape_cast %129 : vector<48x1xf32> to vector<48x1xf32>
    %131 = vector.broadcast %130 : vector<48x1xf32> to vector<48x8xf32>
    %132 = tpu.concatenate %116, %121, %126, %131 in 1 : vector<48x8xf32>, vector<48x8xf32>, vector<48x8xf32>, vector<48x8xf32> -> vector<48x32xf32>
    %cst_44 = arith.constant dense<0.000000e+00> : vector<48x32xf32>
    %133 = tpu.matmul %111, %74, %cst_44 {dimension_numbers = #tpu.dot_dimension_numbers<[1], [0], [0], [1], [0, 0, 1, 1], [], []>} : vector<48x192xf32>, vector<192x32xf32>, vector<48x32xf32> -> vector<48x32xf32>
    %134 = arith.divf %133, %132 : vector<48x32xf32>
    %135 = arith.addf %8, %134 : vector<48x32xf32>
    %cst_45 = arith.constant dense<0.000000e+00> : vector<48xf32>
    %136 = vector.multi_reduction <add>, %135, %cst_45 [1] : vector<48x32xf32> to vector<48xf32>
    %137 = vector.shape_cast %136 : vector<48xf32> to vector<48x1xf32>
    %cst_46 = arith.constant 3.200000e+01 : f32
    %138 = vector.broadcast %cst_46 : f32 to vector<48x1xf32>
    %139 = arith.divf %137, %138 : vector<48x1xf32>
    %140 = vector.broadcast %139 : vector<48x1xf32> to vector<48x32xf32>
    %141 = arith.subf %135, %140 : vector<48x32xf32>
    %142 = arith.mulf %141, %141 : vector<48x32xf32>
    %cst_47 = arith.constant dense<0.000000e+00> : vector<48xf32>
    %143 = vector.multi_reduction <add>, %142, %cst_47 [1] : vector<48x32xf32> to vector<48xf32>
    %144 = vector.shape_cast %143 : vector<48xf32> to vector<48x1xf32>
    %cst_48 = arith.constant 3.200000e+01 : f32
    %145 = vector.broadcast %cst_48 : f32 to vector<48x1xf32>
    %146 = arith.divf %144, %145 : vector<48x1xf32>
    %147 = vector.broadcast %139 : vector<48x1xf32> to vector<48x32xf32>
    %148 = arith.subf %135, %147 : vector<48x32xf32>
    %cst_49 = arith.constant 9.99999974E-6 : f32
    %149 = vector.broadcast %cst_49 : f32 to vector<48x1xf32>
    %150 = arith.addf %146, %149 : vector<48x1xf32>
    %151 = math.rsqrt %150 : vector<48x1xf32>
    %152 = vector.broadcast %151 : vector<48x1xf32> to vector<48x32xf32>
    %153 = arith.mulf %148, %152 : vector<48x32xf32>
    %154 = vector.broadcast %3 : vector<1x32xf32> to vector<48x32xf32>
    %155 = arith.mulf %153, %154 : vector<48x32xf32>
    %156 = vector.broadcast %4 : vector<1x32xf32> to vector<48x32xf32>
    %157 = arith.addf %155, %156 : vector<48x32xf32>
    %c0_50 = arith.constant 0 : index
    %c0_51 = arith.constant 0 : index
    %158 = vector.load %arg4[%c0_50, %c0_51] : memref<32x128xf32, #tpu.memory_space<vmem>>, vector<32x128xf32>
    %cst_52 = arith.constant dense<0.000000e+00> : vector<48x128xf32>
    %159 = tpu.matmul %157, %158, %cst_52 {dimension_numbers = #tpu.dot_dimension_numbers<[1], [0], [0], [1], [0, 0, 1, 1], [], []>} : vector<48x32xf32>, vector<32x128xf32>, vector<48x128xf32> -> vector<48x128xf32>
    %160 = vector.broadcast %1 : vector<1x128xf32> to vector<48x128xf32>
    %161 = arith.addf %159, %160 : vector<48x128xf32>
    %cst_53 = arith.constant 0.000000e+00 : f32
    %162 = vector.broadcast %cst_53 : f32 to vector<48x128xf32>
    %163 = arith.maximumf %161, %162 : vector<48x128xf32>
    %c0_54 = arith.constant 0 : index
    %c0_55 = arith.constant 0 : index
    %164 = vector.load %arg5[%c0_54, %c0_55] : memref<128x32xf32, #tpu.memory_space<vmem>>, vector<128x32xf32>
    %cst_56 = arith.constant dense<0.000000e+00> : vector<48x32xf32>
    %165 = tpu.matmul %163, %164, %cst_56 {dimension_numbers = #tpu.dot_dimension_numbers<[1], [0], [0], [1], [0, 0, 1, 1], [], []>} : vector<48x128xf32>, vector<128x32xf32>, vector<48x32xf32> -> vector<48x32xf32>
    %166 = vector.broadcast %2 : vector<1x32xf32> to vector<48x32xf32>
    %167 = arith.addf %165, %166 : vector<48x32xf32>
    %168 = arith.addf %157, %167 : vector<48x32xf32>
    %cst_57 = arith.constant dense<0.000000e+00> : vector<48xf32>
    %169 = vector.multi_reduction <add>, %168, %cst_57 [1] : vector<48x32xf32> to vector<48xf32>
    %170 = vector.shape_cast %169 : vector<48xf32> to vector<48x1xf32>
    %cst_58 = arith.constant 3.200000e+01 : f32
    %171 = vector.broadcast %cst_58 : f32 to vector<48x1xf32>
    %172 = arith.divf %170, %171 : vector<48x1xf32>
    %173 = vector.broadcast %172 : vector<48x1xf32> to vector<48x32xf32>
    %174 = arith.subf %168, %173 : vector<48x32xf32>
    %175 = arith.mulf %174, %174 : vector<48x32xf32>
    %cst_59 = arith.constant dense<0.000000e+00> : vector<48xf32>
    %176 = vector.multi_reduction <add>, %175, %cst_59 [1] : vector<48x32xf32> to vector<48xf32>
    %177 = vector.shape_cast %176 : vector<48xf32> to vector<48x1xf32>
    %cst_60 = arith.constant 3.200000e+01 : f32
    %178 = vector.broadcast %cst_60 : f32 to vector<48x1xf32>
    %179 = arith.divf %177, %178 : vector<48x1xf32>
    %180 = vector.broadcast %172 : vector<48x1xf32> to vector<48x32xf32>
    %181 = arith.subf %168, %180 : vector<48x32xf32>
    %cst_61 = arith.constant 9.99999974E-6 : f32
    %182 = vector.broadcast %cst_61 : f32 to vector<48x1xf32>
    %183 = arith.addf %179, %182 : vector<48x1xf32>
    %184 = math.rsqrt %183 : vector<48x1xf32>
    %185 = vector.broadcast %184 : vector<48x1xf32> to vector<48x32xf32>
    %186 = arith.mulf %181, %185 : vector<48x32xf32>
    %187 = vector.broadcast %5 : vector<1x32xf32> to vector<48x32xf32>
    %188 = arith.mulf %186, %187 : vector<48x32xf32>
    %189 = vector.broadcast %6 : vector<1x32xf32> to vector<48x32xf32>
    %190 = arith.addf %188, %189 : vector<48x32xf32>
    %c0_62 = arith.constant 0 : index
    %c0_63 = arith.constant 0 : index
    %c0_64 = arith.constant 0 : index
    %191 = vector.load %arg7[%c0_62, %c0_63, %c0_64] : memref<1x48x32xf32, #tpu.memory_space<vmem>>, vector<1x48x32xf32>
    %192 = vector.shape_cast %191 : vector<1x48x32xf32> to vector<48x32xf32>
    %193 = vector.shape_cast %190 : vector<48x32xf32> to vector<1x48x32xf32>
    tpu.vector_store %arg7[%c0_62, %c0_63, %c0_64], %193 {strides = array<i32>} : memref<1x48x32xf32, #tpu.memory_space<vmem>>, vector<1x48x32xf32>,
    return
  }
  func.func @transform_0(%arg0: i32, %arg1: i32) -> (i32, i32, i32) {
    %c0_i32 = arith.constant 0 : i32
    %c0_i32_0 = arith.constant 0 : i32
    %c0_i32_1 = arith.constant 0 : i32
    return %arg0, %c0_i32, %c0_i32_0 : i32, i32, i32
  }
  func.func @transform_1(%arg0: i32, %arg1: i32) -> (i32, i32) {
    %c0_i32 = arith.constant 0 : i32
    %c0_i32_0 = arith.constant 0 : i32
    %c0_i32_1 = arith.constant 0 : i32
    return %c0_i32, %c0_i32_0 : i32, i32
  }
  func.func @transform_2(%arg0: i32, %arg1: i32) -> (i32, i32) {
    %c0_i32 = arith.constant 0 : i32
    %c0_i32_0 = arith.constant 0 : i32
    %c0_i32_1 = arith.constant 0 : i32
    return %c0_i32, %c0_i32_0 : i32, i32
  }
  func.func @transform_3(%arg0: i32, %arg1: i32) -> (i32, i32) {
    %c0_i32 = arith.constant 0 : i32
    %c0_i32_0 = arith.constant 0 : i32
    %c0_i32_1 = arith.constant 0 : i32
    return %c0_i32, %c0_i32_0 : i32, i32
  }
  func.func @transform_4(%arg0: i32, %arg1: i32) -> (i32, i32) {
    %c0_i32 = arith.constant 0 : i32
    %c0_i32_0 = arith.constant 0 : i32
    %c0_i32_1 = arith.constant 0 : i32
    return %c0_i32, %c0_i32_0 : i32, i32
  }
  func.func @transform_5(%arg0: i32, %arg1: i32) -> (i32, i32, i32) {
    %c0_i32 = arith.constant 0 : i32
    %c0_i32_0 = arith.constant 0 : i32
    return %arg0, %arg1, %c0_i32 : i32, i32, i32
  }
}

</mosaic_0001>

<bundles_post_ra>
// kernel: tpu_custom_call.1
= control target key start
LH: loop header
LB: loop body
LE: loop exit
PB: predicated region body
PF: predicated region fallthrough
CT: control target
= control target key end

     0   :  { %s2116_s18 = smov 0   ;;  %s2118_s19 = smov 0   ;;  %s2945_s0 = inlined_call_operand.vmem [shape: f32[2,48,32], index: 0, kind: input, shape index: {}]   ;;  %s2946_s1 = inlined_call_operand.vmem [shape: f32[32,96], index: 1, kind: input, shape index: {}]   ;;  %s2947_s2 = inlined_call_operand.vmem [shape: f32[32,128], index: 2, kind: input, shape index: {}]   ;;  %s2948_s3 = inlined_call_operand.vmem [shape: f32[128,32], index: 3, kind: input, shape index: {}]   ;;  %s2949_s4 = inlined_call_operand.vmem [shape: f32[8,128], index: 4, kind: input, shape index: {}]   ;;  %s2950_s5 = inlined_call_operand.vmem [shape: f32[2,48,32], index: 5, kind: output, shape index: {}]  }
   0x1   :  { %s2120_s20 = smov 0  }
   0x2 LB: > { %s27_s21 = sadd.s32 1, %s2072_s19  ;;  %p1742_p0 = scmp.ge.s32.totalorder %s2076_s20, 1  ;;  %s2076_s20 = sphi %s2120_s20, %s15_s20   ;;  %s2072_s19 = sphi %s2118_s19, %s2958_s19   ;;  %s2068_s18 = sphi %s2116_s18, %s2957_s18  }
   0x3   : > { %p29_p1 = scmp.ge.s32.totalorder %s27_s21, 2  ;;  %p201_p2 = scmp.lt.s32.totalorder %s2076_s20, 3 }
   0x5   : > { %s2960_s21 = smov (%p29_p1, %s27_s21), 0  ;;  %p202_p3 = pnand %p1742_p0, %p201_p2 }
   0x6   : > { %p233_p4 = scmp.lt.s32.totalorder (!%p202_p3), %s2068_s18, 1  ;;  %s2079_s11 = smov (!%p202_p3), 96  }
   0x7   : > { %205 = sbr.rel (%p202_p3) target bundleno = 2183 (0x887), region = 40  ;;  %s2080_s12 = smov (!%p202_p3), 48  }
   0x8   : > { %s2081_s13 = smov (!%p202_p3), 64   ;;  %s2082_s14 = smov (!%p202_p3), 16  }
   0x9   : > { %s2083_s15 = smov (!%p202_p3), 32   ;;  %s2084_s16 = smov (!%p202_p3), 80  }
   0xa   : > { %s2085_s17 = smov (!%p202_p3), 112  }
   0xc   : > { %v264_v0 = vld [vmem:[%s2946_s1 + $0x18] sm:$0xff]  ;;  %v263_v1 = vld [vmem:[%s2946_s1 + $0x10] sm:$0xff]  ;;  %v262_v2 = vld [vmem:[%s2946_s1 + $0x8] sm:$0xff]  ;;  %s2962_s18 = smov (!%p233_p4, %s2068_s18), 1  ;;  %vm269_vm0 = vcmask 261120   ;;  %v2078_v10 = vmov 0.0   ;;  %v383_v21 = vlaneseq }
   0xd   : > { %1880 = vmatprep.subr.mxu0 %v264_v0  ;;  %v261_v3 = vld [vmem:[%s2946_s1] sm:$0xff]  ;;  %s1955_s30 = smul.u32 48, %s2962_s18  ;;  %571 = vmatprep.subr.mxu1 %v2078_v10  ;;  %vm678_vm11 = vcmask 392192   ;;  %vm680_vm12 = vcmask 785408   ;;  %vm682_vm13 = vcmask 130048   ;;  %vm781_vm14 = vcmask 785792  }
   0xe   : > { %1881 = vmatpush3.msra.mxu0 %v264_v0  ;;  %635 = vmatprep.mubr.f32.mxu1 %v2078_v10  ;;  %v1745_v11 = vld [vmem:[%s2949_s4] ss:$0 sm:$0xff]  ;;  %v2192_v25 = vand.u32 127, %v383_v21 }
   0xf   : > { %1882 = vmatprep.subr.mxu0 %v263_v1  ;;  %s2154_s8 = scalar_lea.vmem %s2945_s0, %s1955_s30 }
  0x10   : > { %1883 = vmatpush3.msra.mxu0 %v263_v1  ;;  %v255_v4 = vld [vmem:[%s2154_s8] sm:$0xff]  ;;  %v256_v5 = vld [vmem:[%s2154_s8 + $0x8] sm:$0xff]  ;;  %v257_v6 = vld [vmem:[%s2154_s8 + $0x10] sm:$0xff]  ;;  %vm427_vm1 = vcmp.ge.s32.totalorder %v2192_v25, 16  ;;  %vm428_vm2 = vcmp.lt.s32.totalorder %v2192_v25, 24  ;;  %vm418_vm4 = vcmp.ge.s32.totalorder %v2192_v25, 8 }
  0x11   : > { %1884 = vmatprep.subr.mxu0 %v262_v2  ;;  %1888 = vmatprep.mubr.msk.f32.mxu0 %vm269_vm0, %v255_v4  ;;  %v258_v7 = vld [vmem:[%s2154_s8 + $0x18] sm:$0xff]  ;;  %v259_v8 = vld [vmem:[%s2154_s8 + $0x20] sm:$0xff]  ;;  %v260_v9 = vld [vmem:[%s2154_s8 + $0x28] sm:$0xff]  ;;  %vm419_vm5 = vcmp.lt.s32.totalorder %v2192_v25, 16  ;;  %vm386_vm7 = vcmp.lt.s32.totalorder %v2192_v25, 8  ;;  %vm436_vm8 = vcmp.ge.s32.totalorder %v2192_v25, 24 }
  0x12   : > { %1885 = vmatpush3.msra.mxu0 %v262_v2  ;;  %vm2210_vm3 = vmand %vm427_vm1, %vm428_vm2  ;;  %vm437_vm9 = vcmp.lt.s32.totalorder %v2192_v25, 32  ;;  %vm800_vm1 = vcmask 1048320  }
  0x13   : > { %1886 = vmatprep.subr.mxu0 %v261_v3  ;;  %vm2249_vm6 = vmand %vm418_vm4, %vm419_vm5 }
  0x14   : > { %1887 = vmatpush3.msra.mxu0 %v261_v3  ;;  %vm2377_vm10 = vmand %vm436_vm8, %vm437_vm9 }
  0x15   : > { %1889 = vmatmul.mubr.msk.f32.vlgmr.msra.gmra.mxu0 %vm269_vm0, %v256_v5  ;;  %1093 = vmatprep.subr.mxu0 %v2078_v10 }
  0x16   : > { %1891 = vmatprep.mubr.msk.f32.mxu0 %vm269_vm0, %v257_v6  ;;  %v2492_v6 = vshrl.u32 %v383_v21, 7 }
  0x19   : > { %1892 = vmatmul.mubr.msk.f32.gmra.mxu0 %vm269_vm0, %v258_v7 }
  0x1a   : > { %1894 = vmatprep.mubr.msk.f32.mxu0 %vm269_vm0, %v259_v8 }
  0x1d   : > { %1895 = vmatmul.mubr.msk.f32.gmra.mxu0 %vm269_vm0, %v260_v9  ;;  %v686_v9 = vadd.s32 8, %v2492_v6 }
  0xd5   : > { %v1890_v12 = vpop.f32.mrf.mxu0 }
  0xd6   : > { %v2174_v13 = vadd.f32 %v1890_v12, %v1745_v11 }
  0xd7   : > { %v354_v14 = vpop.f32.mrf.mxu0 }
  0xd8   : > { %396 = vrot.lane.b32.xlu1 %v2174_v13, %s2079_s11  ;;  %v2177_v16 = vadd.f32 %v1745_v11, %v354_v14 }
  0xd9   : > { %v1893_v15 = vpop.f32.mrf.mxu0 }
  0xda   : > { %v2179_v17 = vadd.f32 %v1893_v15, %v1745_v11 }
  0xdb   : > { %v364_v18 = vpop.f32.mrf.mxu0 }
  0xdc   : > { %400 = vrot.lane.b32.xlu0 %v2179_v17, %s2079_s11  ;;  %394 = vrot.lane.b32.xlu1 %v2177_v16, %s2079_s11  ;;  %v2183_v20 = vadd.f32 %v1745_v11, %v364_v18 }
  0xdd   : > { %v1896_v19 = vpop.f32.mrf.mxu0 }
  0xde   : > { %v2185_v23 = vadd.f32 %v1896_v19, %v1745_v11 }
  0xdf   : > { %v374_v22 = vpop.f32.mrf.mxu0 }
  0xe0   : > { %v2187_v24 = vadd.f32 %v1745_v11, %v374_v22  ;;  %398 = vrot.lane.b32.xlu0 %v2183_v20, %s2079_s11 }
  0xe2   : > { %402 = vrot.lane.b32.xlu1 %v2187_v24, %s2079_s11 }
  0xe4   : > { %404 = vrot.lane.b32.xlu0 %v2185_v23, %s2079_s11 }
  0xe6   : > { %674 = vrot.lane.b32.xlu1 %v2192_v25, %s2079_s11 }
  0xe8   : > { %672 = vrot.lane.b32.xlu0 %v2192_v25, %s2080_s12  ;;  %s2922_s12 = scalar_lea.vmem %s2950_s5, %s1955_s30 }
  0xea   : > { %451 = vrot.lane.b32.xlu1 %v2179_v17, %s2081_s13 }
  0xec   : > { %676 = vrot.lane.b32.xlu0 %v2192_v25, %s2082_s14 }
  0xee   : > { %447 = vrot.lane.b32.xlu1 %v2174_v13, %s2081_s13 }
  0xf0   : > { %449 = vrot.lane.b32.xlu0 %v2183_v20, %s2081_s13 }
  0xf2   : > { %455 = vrot.lane.b32.xlu1 %v2185_v23, %s2081_s13 }
  0xf4   : > { %445 = vrot.lane.b32.xlu0 %v2177_v16, %s2081_s13 }
  0xf8   : > { %453 = vrot.lane.b32.xlu0 %v2187_v24, %s2081_s13 }
 0x14a   : > { %v2204_v26 = vpop.permute.xlu1 %396 }
 0x14b   : > { %v431_v35 = vsel %vm2210_vm3, %v2204_v26, 0.0  ;;  %v422_v51 = vsel %vm2249_vm6, %v2204_v26, 0.0  ;;  %v413_v58 = vsel %vm386_vm7, %v2204_v26, 0.0  ;;  %v440_v0 = vsel %vm2377_vm10, %v2204_v26, 0.0 }
 0x14e   : > { %v2208_v27 = vpop.permute.xlu0 %400  ;;  %v2217_v30 = vpop.permute.xlu1 %394 }
 0x14f   : > { %v433_v29 = vsel %vm2210_vm3, %v2208_v27, 0.0  ;;  %v430_v38 = vsel %vm2210_vm3, %v2217_v30, 0.0  ;;  %v424_v47 = vsel %vm2249_vm6, %v2208_v27, 0.0  ;;  %v421_v52 = vsel %vm2249_vm6, %v2217_v30, 0.0 }
 0x150   : > { %1752 = vmatpush1.xpose.msk.msra.mxu1 %vm269_vm0, %v433_v29  ;;  %v415_v55 = vsel %vm386_vm7, %v2208_v27, 0.0  ;;  %v412_v59 = vsel %vm386_vm7, %v2217_v30, 0.0  ;;  %v442_v62 = vsel %vm2377_vm10, %v2208_v27, 0.0  ;;  %v439_v1 = vsel %vm2377_vm10, %v2217_v30, 0.0 }
 0x151   : > { %573 = vmatprep.subr.mxu1 %v2078_v10 }
 0x152   : > { %v2221_v31 = vpop.permute.xlu0 %398 }
 0x153   : > { %v432_v32 = vsel %vm2210_vm3, %v2221_v31, 0.0  ;;  %v423_v50 = vsel %vm2249_vm6, %v2221_v31, 0.0  ;;  %v414_v57 = vsel %vm386_vm7, %v2221_v31, 0.0  ;;  %v441_v63 = vsel %vm2377_vm10, %v2221_v31, 0.0 }
 0x154   : > { %1753 = vmatpush1.xpose.msk.msra.mxu1 %vm269_vm0, %v432_v32  ;;  %v2227_v33 = vpop.permute.xlu1 %402 }
 0x155   : > { %575 = vmatprep.subr.mxu1 %v2078_v10  ;;  %v425_v45 = vsel %vm2249_vm6, %v2227_v33, 0.0  ;;  %v416_v54 = vsel %vm386_vm7, %v2227_v33, 0.0  ;;  %v443_v61 = vsel %vm2377_vm10, %v2227_v33, 0.0  ;;  %v434_v3 = vsel %vm2210_vm3, %v2227_v33, 0.0 }
 0x156   : > { %v2230_v34 = vpop.permute.xlu0 %404 }
 0x157   : > { %v426_v41 = vsel %vm2249_vm6, %v2230_v34, 0.0  ;;  %v417_v53 = vsel %vm386_vm7, %v2230_v34, 0.0  ;;  %v444_v60 = vsel %vm2377_vm10, %v2230_v34, 0.0  ;;  %v435_v2 = vsel %vm2210_vm3, %v2230_v34, 0.0 }
 0x158   : > { %1754 = vmatpush1.xpose.msk.msra.mxu1 %vm269_vm0, %v431_v35  ;;  %v2236_v36 = vpop.permute.xlu1 %674  ;;  %v688_v35 = vadd.s32 24, %v2492_v6 }
 0x159   : > { %577 = vmatprep.subr.mxu1 %v2078_v10 }
 0x15a   : > { %v2241_v37 = vpop.permute.xlu0 %672 }
 0x15b   : > { %v679_v4 = vsel %vm678_vm11, %v2192_v25, %v2241_v37 }
 0x15c   : > { %1755 = vmatpush1.xpose.msk.msra.mxu1 %vm269_vm0, %v430_v38  ;;  %v2247_v39 = vpop.permute.xlu1 %451  ;;  %v2489_v5 = vsel %vm680_vm12, %v679_v4, %v2236_v36 }
 0x15d   : > { %1794 = vmatpush1.msk.msra.mxu0 %vm2210_vm3, %v2247_v39  ;;  %579 = vmatprep.subr.mxu1 %v2078_v10  ;;  %v691_v8 = vsub.s32 %v2492_v6, %v2489_v5  ;;  %v693_v12 = vsub.s32 %v686_v9, %v2489_v5 }
 0x15e   : > { %v2260_v42 = vpop.permute.xlu0 %676  ;;  %1095 = vmatprep.subr.mxu0 %v2078_v10 }
 0x15f   : > { %v2497_v7 = vsel %vm682_vm13, %v2236_v36, %v2260_v42  ;;  %v704_v11 = vsub.s32 0, %v691_v8 }
 0x160   : > { %1756 = vmatpush1.xpose.msk.msra.mxu1 %vm269_vm0, %v426_v41  ;;  %v2265_v43 = vpop.permute.xlu1 %447  ;;  %v694_v14 = vsub.s32 %v686_v9, %v2497_v7 }
 0x161   : > { %581 = vmatprep.subr.mxu1 %v2078_v10  ;;  %v1782_v15 = vmin.u32 %v704_v11, %v691_v8  ;;  %v690_v8 = vadd.s32 40, %v2492_v6 }
 0x162   : > { %v2267_v44 = vpop.permute.xlu0 %449  ;;  %v713_v19 = vsub.s32 0, %v694_v14 }
 0x163   : > { %1795 = vmatpush1.msk.msra.mxu0 %vm2210_vm3, %v2267_v44  ;;  %vm739_vm15 = vcmp.le.s32.totalorder %v1782_v15, 8 }
 0x164   : > { %1757 = vmatpush1.xpose.msk.msra.mxu1 %vm269_vm0, %v425_v45  ;;  %1097 = vmatprep.subr.mxu0 %v2078_v10  ;;  %v2290_v48 = vpop.permute.xlu1 %455  ;;  %v1785_v28 = vmin.u32 %v713_v19, %v694_v14 }
 0x165   : > { %1796 = vmatpush1.msk.msra.mxu0 %vm2210_vm3, %v2265_v43  ;;  %583 = vmatprep.subr.mxu1 %v2078_v10 }
 0x166   : > { %v2281_v46 = vpop.permute.xlu0 %445  ;;  %1099 = vmatprep.subr.mxu0 %v2078_v10  ;;  %vm742_vm5 = vcmp.le.s32.totalorder %v1785_v28, 8 }
 0x167   : > { %1797 = vmatpush1.msk.msra.mxu0 %vm2210_vm3, %v2281_v46 }
 0x168   : > { %1758 = vmatpush1.xpose.msk.msra.mxu1 %vm269_vm0, %v424_v47  ;;  %1101 = vmatprep.subr.mxu0 %v2078_v10 }
 0x169   : > { %1798 = vmatpush1.msk.msra.mxu0 %vm2249_vm6, %v2290_v48  ;;  %585 = vmatprep.subr.mxu1 %v2078_v10 }
 0x16a   : > { %v2298_v49 = vpop.permute.xlu0 %453  ;;  %1103 = vmatprep.subr.mxu0 %v2078_v10 }
 0x16b   : > { %1799 = vmatpush1.msk.msra.mxu0 %vm2249_vm6, %v2298_v49 }
 0x16c   : > { %1759 = vmatpush1.xpose.msk.msra.mxu1 %vm269_vm0, %v423_v50  ;;  %1105 = vmatprep.subr.mxu0 %v2078_v10 }
 0x16d   : > { %1800 = vmatpush1.msk.msra.mxu0 %vm2249_vm6, %v2247_v39  ;;  %587 = vmatprep.subr.mxu1 %v2078_v10 }
 0x16e   : > { %1107 = vmatprep.subr.mxu0 %v2078_v10 }
 0x16f   : > { %1801 = vmatpush1.msk.msra.mxu0 %vm2249_vm6, %v2267_v44 }
 0x170   : > { %1760 = vmatpush1.xpose.msk.msra.mxu1 %vm269_vm0, %v422_v51  ;;  %1109 = vmatprep.subr.mxu0 %v2078_v10 }
 0x171   : > { %1802 = vmatpush1.msk.msra.mxu0 %vm2249_vm6, %v2265_v43  ;;  %589 = vmatprep.subr.mxu1 %v2078_v10 }
 0x172   : > { %1111 = vmatprep.subr.mxu0 %v2078_v10 }
 0x173   : > { %1803 = vmatpush1.msk.msra.mxu0 %vm2249_vm6, %v2281_v46 }
 0x174   : > { %1761 = vmatpush1.xpose.msk.msra.mxu1 %vm269_vm0, %v421_v52  ;;  %1113 = vmatprep.subr.mxu0 %v2078_v10 }
 0x175   : > { %1804 = vmatpush1.msk.msra.mxu0 %vm386_vm7, %v2290_v48  ;;  %591 = vmatprep.subr.mxu1 %v2078_v10 }
 0x176   : > { %1115 = vmatprep.subr.mxu0 %v2078_v10 }
 0x177   : > { %1805 = vmatpush1.msk.msra.mxu0 %vm386_vm7, %v2298_v49 }
 0x178   : > { %1762 = vmatpush1.xpose.msk.msra.mxu1 %vm269_vm0, %v417_v53  ;;  %1117 = vmatprep.subr.mxu0 %v2078_v10 }
 0x179   : > { %1806 = vmatpush1.msk.msra.mxu0 %vm386_vm7, %v2247_v39  ;;  %593 = vmatprep.subr.mxu1 %v2078_v10 }
 0x17a   : > { %1119 = vmatprep.subr.mxu0 %v2078_v10 }
 0x17b   : > { %1807 = vmatpush1.msk.msra.mxu0 %vm386_vm7, %v2267_v44 }
 0x17c   : > { %1763 = vmatpush1.xpose.msk.msra.mxu1 %vm269_vm0, %v416_v54  ;;  %1121 = vmatprep.subr.mxu0 %v2078_v10  ;;  %v689_v54 = vadd.s32 32, %v2492_v6 }
 0x17d   : > { %1808 = vmatpush1.msk.msra.mxu0 %vm386_vm7, %v2265_v43  ;;  %595 = vmatprep.subr.mxu1 %v2078_v10 }
 0x17e   : > { %1123 = vmatprep.subr.mxu0 %v2078_v10 }
 0x17f   : > { %1809 = vmatpush1.msk.msra.mxu0 %vm386_vm7, %v2281_v46 }
 0x180   : > { %1764 = vmatpush1.xpose.msk.msra.mxu1 %vm269_vm0, %v415_v55  ;;  %1141 = vmatprep.subr.mxu0 %v2078_v10 }
 0x181   : > { %1810 = vmatpush2.msk.msra.mxu0 %vm2377_vm10, %v2290_v48  ;;  %597 = vmatprep.subr.mxu1 %v2078_v10 }
 0x182   : > { %1143 = vmatprep.subr.mxu0 %v2078_v10 }
 0x183   : > { %1811 = vmatpush2.msk.msra.mxu0 %vm2377_vm10, %v2298_v49 }
 0x184   : > { %1765 = vmatpush1.xpose.msk.msra.mxu1 %vm269_vm0, %v414_v57  ;;  %1145 = vmatprep.subr.mxu0 %v2078_v10 }
 0x185   : > { %1812 = vmatpush2.msk.msra.mxu0 %vm2377_vm10, %v2247_v39  ;;  %599 = vmatprep.subr.mxu1 %v2078_v10 }
 0x186   : > { %1147 = vmatprep.subr.mxu0 %v2078_v10 }
 0x187   : > { %1813 = vmatpush2.msk.msra.mxu0 %vm2377_vm10, %v2267_v44  ;;  %v698_v44 = vsub.s32 %v688_v35, %v2497_v7 }
 0x188   : > { %1766 = vmatpush1.xpose.msk.msra.mxu1 %vm269_vm0, %v413_v58  ;;  %1149 = vmatprep.subr.mxu0 %v2078_v10 }
 0x189   : > { %1814 = vmatpush2.msk.msra.mxu0 %vm2377_vm10, %v2265_v43  ;;  %601 = vmatprep.subr.mxu1 %v2078_v10  ;;  %v697_v43 = vsub.s32 %v688_v35, %v2489_v5  ;;  %v725_v52 = vsub.s32 0, %v698_v44 }
 0x18a   : > { %1151 = vmatprep.subr.mxu0 %v2078_v10 }
 0x18b   : > { %1815 = vmatpush2.msk.msra.mxu0 %vm2377_vm10, %v2281_v46  ;;  %v722_v51 = vsub.s32 0, %v697_v43 }
 0x18c   : > { %1767 = vmatpush1.xpose.msk.msra.mxu1 %vm269_vm0, %v412_v59  ;;  %1153 = vmatprep.subr.mxu0 %v2078_v10 }
 0x18d   : > { %1816 = vmatpush2.msk.msra.mxu0 %vm2210_vm3, %v2290_v48  ;;  %619 = vmatprep.subr.mxu1 %v2078_v10  ;;  %v1788_v59 = vmin.u32 %v722_v51, %v697_v43 }
 0x18e   : > { %1155 = vmatprep.subr.mxu0 %v2078_v10 }
 0x18f   : > { %1817 = vmatpush2.msk.msra.mxu0 %vm2210_vm3, %v2298_v49  ;;  %vm831_vm3 = vcmask 523392   ;;  %vm745_vm8 = vcmp.le.s32.totalorder %v1788_v59, 8 }
 0x190   : > { %1768 = vmatpush2.xpose.msk.msra.mxu1 %vm269_vm0, %v444_v60  ;;  %v1789_v60 = vmin.u32 %v725_v52, %v698_v44 }
 0x191   : > { %621 = vmatprep.subr.mxu1 %v2078_v10 }
 0x192   : > { %vm746_vm9 = vcmp.le.s32.totalorder %v1789_v60, 8 }
 0x194   : > { %1769 = vmatpush2.xpose.msk.msra.mxu1 %vm269_vm0, %v443_v61  ;;  %v699_v61 = vsub.s32 %v689_v54, %v2489_v5 }
 0x195   : > { %623 = vmatprep.subr.mxu1 %v2078_v10 }
 0x196   : > { %v728_v4 = vsub.s32 0, %v699_v61 }
 0x198   : > { %1770 = vmatpush2.xpose.msk.msra.mxu1 %vm269_vm0, %v442_v62  ;;  %v700_v62 = vsub.s32 %v689_v54, %v2497_v7  ;;  %v1790_v15 = vmin.u32 %v728_v4, %v699_v61 }
 0x199   : > { %625 = vmatprep.subr.mxu1 %v2078_v10 }
 0x19a   : > { %vm747_vm10 = vcmp.le.s32.totalorder %v1790_v15, 8 }
 0x19c   : > { %1771 = vmatpush2.xpose.msk.msra.mxu1 %vm269_vm0, %v441_v63 }
 0x19d   : > { %627 = vmatprep.subr.mxu1 %v2078_v10 }
 0x1a0   : > { %1772 = vmatpush2.xpose.msk.msra.mxu1 %vm269_vm0, %v440_v0 }
 0x1a1   : > { %629 = vmatprep.subr.mxu1 %v2078_v10 }
 0x1a4   : > { %1773 = vmatpush2.xpose.msk.msra.mxu1 %vm269_vm0, %v439_v1 }
 0x1a5   : > { %631 = vmatprep.subr.mxu1 %v2078_v10 }
 0x1a8   : > { %1774 = vmatpush2.xpose.msk.msra.mxu1 %vm269_vm0, %v435_v2 }
 0x1a9   : > { %633 = vmatprep.subr.mxu1 %v2078_v10 }
 0x1ac   : > { %1775 = vmatpush2.xpose.msk.msra.mxu1 %vm269_vm0, %v434_v3 }
 0x1af   : > { %1776 = vmatmul.mubr.msk.f32.vlgmr.msra.gmra.mxu1 %vm269_vm0, %v2177_v16  ;;  %v687_v16 = vadd.s32 16, %v2492_v6 }
 0x1b0   : > { %641 = vmatprep.mubr.f32.mxu1 %v2078_v10 }
 0x1b1   : > { %v695_v21 = vsub.s32 %v687_v16, %v2489_v5 }
 0x1b3   : > { %1777 = vmatmul.mubr.msk.f32.gmra.mxu1 %vm269_vm0, %v2174_v13  ;;  %v716_v34 = vsub.s32 0, %v695_v21 }
 0x1b4   : > { %647 = vmatprep.mubr.f32.mxu1 %v2078_v10 }
 0x1b5   : > { %v1786_v42 = vmin.u32 %v716_v34, %v695_v21 }
 0x1b7   : > { %1778 = vmatmul.mubr.msk.f32.gmra.mxu1 %vm269_vm0, %v2183_v20  ;;  %vm743_vm6 = vcmp.le.s32.totalorder %v1786_v42, 8 }
 0x1b8   : > { %653 = vmatprep.mubr.f32.mxu1 %v2078_v10 }
 0x1bb   : > { %1779 = vmatmul.mubr.msk.f32.gmra.mxu1 %vm269_vm0, %v2179_v17  ;;  %v710_v17 = vsub.s32 0, %v693_v12 }
 0x1bc   : > { %659 = vmatprep.mubr.f32.mxu1 %v2078_v10 }
 0x1bf   : > { %1780 = vmatmul.mubr.msk.f32.gmra.mxu1 %vm269_vm0, %v2187_v24  ;;  %v696_v24 = vsub.s32 %v687_v16, %v2497_v7  ;;  %v701_v16 = vsub.s32 %v690_v8, %v2489_v5 }
 0x1c0   : > { %665 = vmatprep.mubr.f32.mxu1 %v2078_v10  ;;  %v692_v10 = vsub.s32 %v2492_v6, %v2497_v7 }
 0x1c1   : > { %v719_v38 = vsub.s32 0, %v696_v24 }
 0x1c2   : > { %v707_v13 = vsub.s32 0, %v692_v10 }
 0x1c3   : > { %1781 = vmatmul.mubr.msk.f32.gmra.mxu1 %vm269_vm0, %v2185_v23  ;;  %v1784_v23 = vmin.u32 %v710_v17, %v693_v12  ;;  %v1787_v45 = vmin.u32 %v719_v38, %v696_v24  ;;  %v702_v17 = vsub.s32 %v690_v8, %v2497_v7  ;;  %v734_v24 = vsub.s32 0, %v701_v16 }
 0x1c4   : > { %v1783_v18 = vmin.u32 %v707_v13, %v692_v10  ;;  %v731_v10 = vsub.s32 0, %v700_v62 }
 0x1c5   : > { %vm741_vm4 = vcmp.le.s32.totalorder %v1784_v23, 8  ;;  %vm744_vm7 = vcmp.le.s32.totalorder %v1787_v45, 8  ;;  %v737_v7 = vsub.s32 0, %v702_v17 }
 0x1c6   : > { %vm740_vm2 = vcmp.le.s32.totalorder %v1783_v18, 8  ;;  %v1791_v6 = vmin.u32 %v731_v10, %v700_v62 }
 0x26f   : > { %v637_v20 = vpop.f32.mrf.mxu1 }
 0x270   : > { %v2508_v22 = vsel %vm739_vm15, %v637_v20, -1e+30  ;;  %vm748_vm15 = vcmp.le.s32.totalorder %v1791_v6, 8 }
 0x271   : > { %v639_v25 = vpop.f32.mrf.mxu1  ;;  %v782_v26 = vsel %vm781_vm14, %v2508_v22, -inf  ;;  %v763_v27 = vsel %vm678_vm11, %v2508_v22, -inf  ;;  %v801_v31 = vsel %vm800_vm1, %v2508_v22, -inf }
 0x272   : > { %v2515_v29 = vsel %vm740_vm2, %v639_v25, -1e+30  ;;  %783 = vmax.xlane.f32.xlu0 %v782_v26  ;;  %764 = vmax.xlane.f32.xlu1 %v763_v27 }
 0x273   : > { %v643_v30 = vpop.f32.mrf.mxu1  ;;  %v802_v32 = vsel %vm682_vm13, %v2515_v29, -inf  ;;  %v832_v37 = vsel %vm831_vm3, %v2515_v29, -inf }
 0x274   : > { %v803_v33 = vmax.f32 %v801_v31, %v802_v32  ;;  %v2524_v39 = vsel %vm741_vm4, %v643_v30, -1e+30  ;;  %v1792_v30 = vmin.u32 %v734_v24, %v701_v16  ;;  %v1793_v31 = vmin.u32 %v737_v7, %v702_v17 }
 0x275   : > { %v645_v36 = vpop.f32.mrf.mxu1  ;;  %v766_v46 = vsel %vm678_vm11, %v2524_v39, -inf  ;;  %v785_v47 = vsel %vm781_vm14, %v2524_v39, -inf  ;;  %v806_v50 = vsel %vm800_vm1, %v2524_v39, -inf }
 0x276   : > { %v2526_v40 = vsel %vm742_vm5, %v645_v36, -1e+30  ;;  %804 = vmax.xlane.f32.xlu0 %v803_v33  ;;  %833 = vmax.xlane.f32.xlu1 %v832_v37  ;;  %vm749_vm2 = vcmp.le.s32.totalorder %v1792_v30, 8  ;;  %vm750_vm4 = vcmp.le.s32.totalorder %v1793_v31, 8 }
 0x277   : > { %v649_v41 = vpop.f32.mrf.mxu1  ;;  %v807_v48 = vsel %vm682_vm13, %v2526_v40, -inf  ;;  %v835_v55 = vsel %vm831_vm3, %v2526_v40, -inf }
 0x278   : > { %v808_v53 = vmax.f32 %v806_v50, %v807_v48  ;;  %v2541_v56 = vsel %vm743_vm6, %v649_v41, -1e+30 }
 0x279   : > { %v651_v49 = vpop.f32.mrf.mxu1  ;;  %v769_v63 = vsel %vm678_vm11, %v2541_v56, -inf  ;;  %v788_v0 = vsel %vm781_vm14, %v2541_v56, -inf  ;;  %v811_v3 = vsel %vm800_vm1, %v2541_v56, -inf }
 0x27a   : > { %767 = vmax.xlane.f32.xlu0 %v766_v46  ;;  %786 = vmax.xlane.f32.xlu1 %v785_v47  ;;  %v2543_v57 = vsel %vm744_vm7, %v651_v49, -1e+30 }
 0x27b   : > { %v655_v58 = vpop.f32.mrf.mxu1  ;;  %v812_v1 = vsel %vm682_vm13, %v2543_v57, -inf  ;;  %v838_v11 = vsel %vm831_vm3, %v2543_v57, -inf }
 0x27c   : > { %v813_v9 = vmax.f32 %v811_v3, %v812_v1  ;;  %v2558_v12 = vsel %vm745_vm8, %v655_v58, -1e+30 }
 0x27d   : > { %v657_v2 = vpop.f32.mrf.mxu1  ;;  %v772_v18 = vsel %vm678_vm11, %v2558_v12, -inf  ;;  %v791_v19 = vsel %vm781_vm14, %v2558_v12, -inf  ;;  %v816_v23 = vsel %vm800_vm1, %v2558_v12, -inf }
 0x27e   : > { %809 = vmax.xlane.f32.xlu0 %v808_v53  ;;  %836 = vmax.xlane.f32.xlu1 %v835_v55  ;;  %v2560_v13 = vsel %vm746_vm9, %v657_v2, -1e+30 }
 0x27f   : > { %v661_v14 = vpop.f32.mrf.mxu1  ;;  %v817_v20 = vsel %vm682_vm13, %v2560_v13, -inf  ;;  %v841_v25 = vsel %vm831_vm3, %v2560_v13, -inf }
 0x280   : > { %v818_v5 = vmax.f32 %v816_v23, %v817_v20  ;;  %v2574_v26 = vsel %vm747_vm10, %v661_v14, -1e+30 }
 0x281   : > { %v663_v21 = vpop.f32.mrf.mxu1  ;;  %v775_v32 = vsel %vm678_vm11, %v2574_v26, -inf  ;;  %v794_v33 = vsel %vm781_vm14, %v2574_v26, -inf  ;;  %v821_v36 = vsel %vm800_vm1, %v2574_v26, -inf }
 0x282   : > { %770 = vmax.xlane.f32.xlu0 %v769_v63  ;;  %789 = vmax.xlane.f32.xlu1 %v788_v0  ;;  %v2576_v27 = vsel %vm748_vm15, %v663_v21, -1e+30 }
 0x283   : > { %v667_v28 = vpop.f32.mrf.mxu1  ;;  %v822_v34 = vsel %vm682_vm13, %v2576_v27, -inf  ;;  %v844_v38 = vsel %vm831_vm3, %v2576_v27, -inf }
 0x284   : > { %v823_v37 = vmax.f32 %v821_v36, %v822_v34  ;;  %v2588_v41 = vsel %vm749_vm2, %v667_v28, -1e+30 }
 0x285   : > { %v669_v35 = vpop.f32.mrf.mxu1  ;;  %v778_v43 = vsel %vm678_vm11, %v2588_v41, -inf  ;;  %v797_v44 = vsel %vm781_vm14, %v2588_v41, -inf  ;;  %v826_v46 = vsel %vm800_vm1, %v2588_v41, -inf  ;;  %vm1080_vm14 = vcmask 523264  }
 0x286   : > { %814 = vmax.xlane.f32.xlu0 %v813_v9  ;;  %839 = vmax.xlane.f32.xlu1 %v838_v11  ;;  %v2590_v42 = vsel %vm750_vm4, %v669_v35, -1e+30  ;;  %vm1073_vm1 = vcmask 195584  }
 0x287   : > { %v827_v45 = vsel %vm682_vm13, %v2590_v42, -inf  ;;  %v847_v48 = vsel %vm831_vm3, %v2590_v42, -inf }
 0x288   : > { %v828_v47 = vmax.f32 %v826_v46, %v827_v45 }
 0x28a   : > { %773 = vmax.xlane.f32.xlu0 %v772_v18  ;;  %792 = vmax.xlane.f32.xlu1 %v791_v19 }
 0x28e   : > { %819 = vmax.xlane.f32.xlu0 %v818_v5  ;;  %842 = vmax.xlane.f32.xlu1 %v841_v25 }
 0x292   : > { %776 = vmax.xlane.f32.xlu0 %v775_v32  ;;  %795 = vmax.xlane.f32.xlu1 %v794_v33 }
 0x296   : > { %824 = vmax.xlane.f32.xlu0 %v823_v37  ;;  %845 = vmax.xlane.f32.xlu1 %v844_v38 }
 0x29a   : > { %779 = vmax.xlane.f32.xlu0 %v778_v43  ;;  %798 = vmax.xlane.f32.xlu1 %v797_v44 }
 0x29e   : > { %829 = vmax.xlane.f32.xlu0 %v828_v47  ;;  %848 = vmax.xlane.f32.xlu1 %v847_v48 }
 0x2fb   : > { %v784_v49 = vpop.xlane.xlu0 %783  ;;  %v765_v50 = vpop.xlane.xlu1 %764 }
 0x2fc   : > { %v850_v51 = vsel %vm678_vm11, %v765_v50, %v784_v49 }
 0x2ff   : > { %v805_v52 = vpop.xlane.xlu0 %804  ;;  %v834_v53 = vpop.xlane.xlu1 %833 }
 0x300   : > { %v856_v54 = vsel %vm680_vm12, %v850_v51, %v805_v52  ;;  %v862_v55 = vsel %vm682_vm13, %v805_v52, %v834_v53 }
 0x301   : > { %v868_v58 = vsub.f32 %v2508_v22, %v856_v54  ;;  %v869_v59 = vsub.f32 %v2515_v29, %v862_v55 }
 0x303   : > { %v880_v60 = vmul.f32 1.442695, %v868_v58  ;;  %v882_v61 = vmul.f32 1.442695, %v869_v59  ;;  %v768_v62 = vpop.xlane.xlu0 %767  ;;  %v787_v63 = vpop.xlane.xlu1 %786 }
 0x304   : > { %v851_v0 = vsel %vm678_vm11, %v768_v62, %v787_v63 }
 0x305   : > { %1988 = vpow2.f32 %v880_v60 }
 0x306   : > { %1990 = vpow2.f32 %v882_v61 }
 0x307   : > { %v810_v1 = vpop.xlane.xlu0 %809  ;;  %v837_v2 = vpop.xlane.xlu1 %836 }
 0x308   : > { %v857_v3 = vsel %vm680_vm12, %v851_v0, %v810_v1  ;;  %v863_v4 = vsel %vm682_vm13, %v810_v1, %v837_v2 }
 0x309   : > { %v870_v8 = vsub.f32 %v2524_v39, %v857_v3  ;;  %v871_v22 = vsub.f32 %v2526_v40, %v863_v4 }
 0x30b   : > { %v884_v9 = vmul.f32 1.442695, %v870_v8  ;;  %v886_v29 = vmul.f32 1.442695, %v871_v22  ;;  %v771_v10 = vpop.xlane.xlu0 %770  ;;  %v790_v11 = vpop.xlane.xlu1 %789 }
 0x30c   : > { %v852_v14 = vsel %vm678_vm11, %v771_v10, %v790_v11 }
 0x30d   : > { %1992 = vpow2.f32 %v884_v9 }
 0x30e   : > { %1994 = vpow2.f32 %v886_v29 }
 0x30f   : > { %v815_v15 = vpop.xlane.xlu0 %814  ;;  %v840_v16 = vpop.xlane.xlu1 %839 }
 0x310   : > { %v858_v17 = vsel %vm680_vm12, %v852_v14, %v815_v15  ;;  %v864_v6 = vsel %vm682_vm13, %v815_v15, %v840_v16 }
 0x311   : > { %v872_v18 = vsub.f32 %v2541_v56, %v858_v17  ;;  %v873_v39 = vsub.f32 %v2543_v57, %v864_v6 }
 0x312   : > { %v2617_v40 = vpop.eup %1988 }
 0x313   : > { %v1991_v19 = vpop.eup %1990  ;;  %v888_v20 = vmul.f32 1.442695, %v872_v18  ;;  %v890_v21 = vmul.f32 1.442695, %v873_v39  ;;  %v774_v23 = vpop.xlane.xlu0 %773  ;;  %970 = vrot.lane.b32.xlu1 %v2617_v40, %s2083_s15  ;;  %928 = vrot.lane.b32.xlu0 %v2617_v40, %s2084_s16  ;;  %v904_v3 = vsel %vm678_vm11, %v2617_v40, 0.0 }
 0x314   : > { %v793_v24 = vpop.xlane.xlu1 %792  ;;  %1818 = vmatprep.mubr.msk.f32.mxu0 %vm1080_vm14, %v1991_v19 }
 0x315   : > { %1996 = vpow2.f32 %v888_v20  ;;  %1158 = vmatmul.mubr.f32.vlgmr.msra.gmra.mxu0 %v2617_v40  ;;  %v853_v56 = vsel %vm678_vm11, %v774_v23, %v793_v24 }
 0x316   : > { %1998 = vpow2.f32 %v890_v21 }
 0x317   : > { %v820_v57 = vpop.xlane.xlu0 %819  ;;  %972 = vrot.lane.b32.xlu1 %v1991_v19, %s2083_s15 }
 0x318   : > { %v843_v5 = vpop.xlane.xlu1 %842  ;;  %v859_v7 = vsel %vm680_vm12, %v853_v56, %v820_v57 }
 0x319   : > { %v865_v25 = vsel %vm682_vm13, %v820_v57, %v843_v5  ;;  %v874_v28 = vsub.f32 %v2558_v12, %v859_v7 }
 0x31a   : > { %v875_v30 = vsub.f32 %v2560_v13, %v865_v25  ;;  %v2631_v31 = vpop.eup %1992 }
 0x31b   : > { %v1995_v32 = vpop.eup %1994  ;;  %v892_v33 = vmul.f32 1.442695, %v874_v28  ;;  %v777_v35 = vpop.xlane.xlu0 %776  ;;  %1024 = vrot.lane.b32.xlu1 %v1991_v19, %s2085_s17  ;;  %930 = vrot.lane.b32.xlu0 %v2631_v31, %s2084_s16  ;;  %v907_v1 = vsel %vm678_vm11, %v2631_v31, 0.0 }
 0x31c   : > { %v894_v34 = vmul.f32 1.442695, %v875_v30  ;;  %v796_v36 = vpop.xlane.xlu1 %795  ;;  %1819 = vmatprep.mubr.msk.f32.mxu0 %vm1080_vm14, %v1995_v32 }
 0x31d   : > { %2000 = vpow2.f32 %v892_v33  ;;  %1163 = vmatmul.mubr.f32.gmra.mxu0 %v2631_v31  ;;  %v854_v12 = vsel %vm678_vm11, %v777_v35, %v796_v36 }
 0x31e   : > { %2002 = vpow2.f32 %v894_v34 }
 0x31f   : > { %v825_v13 = vpop.xlane.xlu0 %824  ;;  %974 = vrot.lane.b32.xlu1 %v2631_v31, %s2083_s15  ;;  %976 = vrot.lane.b32.xlu0 %v1995_v32, %s2083_s15 }
 0x320   : > { %v846_v37 = vpop.xlane.xlu1 %845  ;;  %v860_v38 = vsel %vm680_vm12, %v854_v12, %v825_v13 }
 0x321   : > { %v866_v43 = vsel %vm682_vm13, %v825_v13, %v846_v37  ;;  %v876_v44 = vsub.f32 %v2574_v26, %v860_v38 }
 0x322   : > { %v877_v45 = vsub.f32 %v2576_v27, %v866_v43  ;;  %v1997_v46 = vpop.eup %1996 }
 0x323   : > { %v1999_v47 = vpop.eup %1998  ;;  %v896_v48 = vmul.f32 1.442695, %v876_v44  ;;  %v780_v50 = vpop.xlane.xlu0 %779  ;;  %1026 = vrot.lane.b32.xlu0 %v1995_v32, %s2085_s17  ;;  %932 = vrot.lane.b32.xlu1 %v1997_v46, %s2084_s16  ;;  %v910_v2 = vsel %vm678_vm11, %v1997_v46, 0.0 }
 0x324   : > { %v898_v49 = vmul.f32 1.442695, %v877_v45  ;;  %v799_v51 = vpop.xlane.xlu1 %798  ;;  %1820 = vmatprep.mubr.msk.f32.mxu0 %vm1080_vm14, %v1999_v47 }
 0x325   : > { %2004 = vpow2.f32 %v896_v48  ;;  %1168 = vmatmul.mubr.f32.gmra.mxu0 %v1997_v46  ;;  %v855_v52 = vsel %vm678_vm11, %v780_v50, %v799_v51 }
 0x326   : > { %2006 = vpow2.f32 %v898_v49 }
 0x327   : > { %v830_v26 = vpop.xlane.xlu0 %829  ;;  %978 = vrot.lane.b32.xlu0 %v1997_v46, %s2083_s15  ;;  %980 = vrot.lane.b32.xlu1 %v1999_v47, %s2083_s15 }
 0x328   : > { %v849_v27 = vpop.xlane.xlu1 %848  ;;  %v861_v53 = vsel %vm680_vm12, %v855_v52, %v830_v26  ;;  %vm1060_vm12 = vcmask 64512  }
 0x329   : > { %v867_v54 = vsel %vm682_vm13, %v830_v26, %v849_v27  ;;  %v878_v55 = vsub.f32 %v2588_v41, %v861_v53 }
 0x32a   : > { %v879_v58 = vsub.f32 %v2590_v42, %v867_v54  ;;  %v2001_v59 = vpop.eup %2000 }
 0x32b   : > { %v2003_v60 = vpop.eup %2002  ;;  %v900_v61 = vmul.f32 1.442695, %v878_v55  ;;  %1028 = vrot.lane.b32.xlu1 %v1999_v47, %s2085_s17  ;;  %934 = vrot.lane.b32.xlu0 %v2001_v59, %s2084_s16  ;;  %v913_v6 = vsel %vm678_vm11, %v2001_v59, 0.0 }
 0x32c   : > { %v902_v62 = vmul.f32 1.442695, %v879_v58  ;;  %1821 = vmatprep.mubr.msk.f32.mxu0 %vm1080_vm14, %v2003_v60 }
 0x32d   : > { %2008 = vpow2.f32 %v900_v61  ;;  %1173 = vmatmul.mubr.f32.gmra.mxu0 %v2001_v59 }
 0x32e   : > { %2010 = vpow2.f32 %v902_v62 }
 0x32f   : > { %982 = vrot.lane.b32.xlu1 %v2001_v59, %s2083_s15  ;;  %984 = vrot.lane.b32.xlu0 %v2003_v60, %s2083_s15 }
 0x332   : > { %v2005_v41 = vpop.eup %2004 }
 0x333   : > { %v2007_v63 = vpop.eup %2006  ;;  %1030 = vrot.lane.b32.xlu0 %v2003_v60, %s2085_s17  ;;  %936 = vrot.lane.b32.xlu1 %v2005_v41, %s2084_s16  ;;  %v916_v19 = vsel %vm678_vm11, %v2005_v41, 0.0 }
 0x334   : > { %1822 = vmatprep.mubr.msk.f32.mxu0 %vm1080_vm14, %v2007_v63 }
 0x335   : > { %1178 = vmatmul.mubr.f32.gmra.mxu0 %v2005_v41 }
 0x337   : > { %986 = vrot.lane.b32.xlu0 %v2005_v41, %s2083_s15  ;;  %988 = vrot.lane.b32.xlu1 %v2007_v63, %s2083_s15 }
 0x33a   : > { %v2009_v42 = vpop.eup %2008 }
 0x33b   : > { %v2011_v0 = vpop.eup %2010  ;;  %1032 = vrot.lane.b32.xlu1 %v2007_v63, %s2085_s17  ;;  %938 = vrot.lane.b32.xlu0 %v2009_v42, %s2084_s16  ;;  %v919_v24 = vsel %vm678_vm11, %v2009_v42, 0.0 }
 0x33c   : > { %1823 = vmatprep.mubr.msk.f32.mxu0 %vm1080_vm14, %v2011_v0 }
 0x33d   : > { %1183 = vmatmul.mubr.f32.gmra.mxu0 %v2009_v42 }
 0x33f   : > { %990 = vrot.lane.b32.xlu1 %v2009_v42, %s2083_s15 }
 0x35a   : > { %908 = vadd.xlane.f32.xlu0 %v907_v1 }
 0x35e   : > { %911 = vadd.xlane.f32.xlu0 %v910_v2 }
 0x363   : > { %905 = vadd.xlane.f32.xlu1 %v904_v3 }
 0x374   : > { %992 = vrot.lane.b32.xlu0 %v2011_v0, %s2083_s15 }
 0x378   : > { %1034 = vrot.lane.b32.xlu0 %v2011_v0, %s2085_s17 }
 0x385   : > { %v971_v4 = vpop.permute.xlu1 %970  ;;  %v929_v8 = vpop.permute.xlu0 %928 }
 0x386   : > { %v946_v5 = vsel %vm678_vm11, %v929_v8, 0.0 }
 0x389   : > { %v973_v22 = vpop.permute.xlu1 %972 }
 0x38a   : > { %v994_v32 = vsel %vm269_vm0, %v971_v4, %v973_v22 }
 0x38b   : > { %v1006_v36 = vsel %vm678_vm11, %v994_v32, 0.0 }
 0x38d   : > { %v931_v9 = vpop.permute.xlu0 %930  ;;  %v1025_v29 = vpop.permute.xlu1 %1024 }
 0x38e   : > { %v949_v10 = vsel %vm678_vm11, %v931_v9, 0.0  ;;  %v1042_v30 = vsel %vm678_vm11, %v1025_v29, 0.0 }
 0x38f   : > { %950 = vadd.xlane.f32.xlu1 %v949_v10 }
 0x391   : > { %v977_v11 = vpop.permute.xlu0 %976  ;;  %v975_v14 = vpop.permute.xlu1 %974 }
 0x392   : > { %v995_v18 = vsel %vm269_vm0, %v975_v14, %v977_v11 }
 0x393   : > { %v1009_v20 = vsel %vm678_vm11, %v995_v18, 0.0 }
 0x395   : > { %v1027_v15 = vpop.permute.xlu0 %1026  ;;  %v933_v16 = vpop.permute.xlu1 %932 }
 0x396   : > { %v1045_v17 = vsel %vm678_vm11, %v1027_v15, 0.0  ;;  %v952_v56 = vsel %vm678_vm11, %v933_v16, 0.0 }
 0x397   : > { %1046 = vadd.xlane.f32.xlu1 %v1045_v17  ;;  %914 = vadd.xlane.f32.xlu0 %v913_v6 }
 0x399   : > { %v979_v39 = vpop.permute.xlu0 %978  ;;  %v981_v40 = vpop.permute.xlu1 %980 }
 0x39a   : > { %v996_v43 = vsel %vm269_vm0, %v979_v39, %v981_v40 }
 0x39b   : > { %917 = vadd.xlane.f32.xlu0 %v916_v19  ;;  %1010 = vadd.xlane.f32.xlu1 %v1009_v20  ;;  %v1012_v45 = vsel %vm678_vm11, %v996_v43, 0.0 }
 0x39d   : > { %v935_v21 = vpop.permute.xlu0 %934  ;;  %v1029_v23 = vpop.permute.xlu1 %1028 }
 0x39e   : > { %v955_v7 = vsel %vm678_vm11, %v935_v21, 0.0  ;;  %v1048_v13 = vsel %vm678_vm11, %v1029_v23, 0.0 }
 0x39f   : > { %920 = vadd.xlane.f32.xlu0 %v919_v24  ;;  %953 = vadd.xlane.f32.xlu1 %v952_v56 }
 0x3a1   : > { %v985_v57 = vpop.permute.xlu0 %984  ;;  %v983_v25 = vpop.permute.xlu1 %982 }
 0x3a2   : > { %v997_v33 = vsel %vm269_vm0, %v983_v25, %v985_v57 }
 0x3a3   : > { %947 = vadd.xlane.f32.xlu0 %v946_v5  ;;  %956 = vadd.xlane.f32.xlu1 %v955_v7  ;;  %v1015_v12 = vsel %vm678_vm11, %v997_v33, 0.0 }
 0x3a5   : > { %v1031_v28 = vpop.permute.xlu0 %1030  ;;  %v937_v35 = vpop.permute.xlu1 %936 }
 0x3a6   : > { %v1051_v31 = vsel %vm678_vm11, %v1031_v28, 0.0  ;;  %v958_v37 = vsel %vm678_vm11, %v937_v35, 0.0 }
 0x3a7   : > { %1043 = vadd.xlane.f32.xlu0 %v1042_v30  ;;  %1052 = vadd.xlane.f32.xlu1 %v1051_v31  ;;  %v2048_v30 = vld [vmem:[%s2154_s8 + $0x8] sm:$0xff] }
 0x3a9   : > { %v987_v34 = vpop.permute.xlu0 %986  ;;  %v989_v44 = vpop.permute.xlu1 %988 }
 0x3aa   : > { %v998_v47 = vsel %vm269_vm0, %v987_v34, %v989_v44 }
 0x3ab   : > { %1007 = vadd.xlane.f32.xlu0 %v1006_v36  ;;  %1016 = vadd.xlane.f32.xlu1 %v1015_v12  ;;  %v1018_v48 = vsel %vm678_vm11, %v998_v47, 0.0 }
 0x3ad   : > { %v939_v38 = vpop.permute.xlu0 %938  ;;  %v1033_v49 = vpop.permute.xlu1 %1032 }
 0x3ae   : > { %v961_v46 = vsel %vm678_vm11, %v939_v38, 0.0  ;;  %v1054_v50 = vsel %vm678_vm11, %v1033_v49, 0.0 }
 0x3af   : > { %1049 = vadd.xlane.f32.xlu0 %v1048_v13  ;;  %959 = vadd.xlane.f32.xlu1 %v958_v37 }
 0x3b1   : > { %v991_v59 = vpop.permute.xlu1 %990 }
 0x3b3   : > { %1013 = vadd.xlane.f32.xlu0 %v1012_v45  ;;  %962 = vadd.xlane.f32.xlu1 %v961_v46 }
 0x3b7   : > { %1019 = vadd.xlane.f32.xlu0 %v1018_v48 }
 0x3bb   : > { %1055 = vadd.xlane.f32.xlu0 %v1054_v50 }
 0x3d5   : > { %v2701_v51 = vpop.f32.mrf.mxu0 }
 0x3d7   : > { %v1161_v52 = vpop.f32.mrf.mxu0 }
 0x3dd   : > { %v1164_v26 = vpop.f32.mrf.mxu0 }
 0x3df   : > { %v1166_v27 = vpop.f32.mrf.mxu0 }
 0x3e3   : > { %v909_v53 = vpop.xlane.xlu0 %908 }
 0x3e5   : > { %v2703_v54 = vpop.f32.mrf.mxu0 }
 0x3e7   : > { %v1171_v55 = vpop.f32.mrf.mxu0  ;;  %v912_v58 = vpop.xlane.xlu0 %911 }
 0x3eb   : > { %v993_v60 = vpop.permute.xlu0 %992 }
 0x3ec   : > { %v999_v61 = vsel %vm269_vm0, %v991_v59, %v993_v60  ;;  %v906_v8 = vpop.xlane.xlu1 %905 }
 0x3ed   : > { %v2706_v62 = vpop.f32.mrf.mxu0  ;;  %v1021_v41 = vsel %vm678_vm11, %v999_v61, 0.0 }
 0x3ee   : > { %1022 = vadd.xlane.f32.xlu1 %v1021_v41  ;;  %v2051_v41 = vld [vmem:[%s2154_s8 + $0x10] sm:$0xff] }
 0x3ef   : > { %v1176_v63 = vpop.f32.mrf.mxu0  ;;  %v1035_v42 = vpop.permute.xlu0 %1034 }
 0x3f0   : > { %v1057_v0 = vsel %vm678_vm11, %v1035_v42, 0.0 }
 0x3f2   : > { %1058 = vadd.xlane.f32.xlu1 %v1057_v0  ;;  %v2052_v0 = vld [vmem:[%s2154_s8 + $0x20] sm:$0xff] }
 0x3f5   : > { %v2710_v1 = vpop.f32.mrf.mxu0 }
 0x3f7   : > { %v1181_v2 = vpop.f32.mrf.mxu0 }
 0x3fd   : > { %v2712_v3 = vpop.f32.mrf.mxu0 }
 0x3ff   : > { %v1186_v4 = vpop.f32.mrf.mxu0 }
 0x418   : > { %v951_v22 = vpop.xlane.xlu1 %950 }
 0x419   : > { %v1062_v10 = vsel %vm1060_vm12, %v909_v53, %v951_v22  ;;  %v2050_v53 = vld [vmem:[%s2154_s8 + $0x18] sm:$0xff] }
 0x420   : > { %v915_v9 = vpop.xlane.xlu0 %914  ;;  %v1047_v29 = vpop.xlane.xlu1 %1046 }
 0x424   : > { %v918_v11 = vpop.xlane.xlu0 %917  ;;  %v1011_v14 = vpop.xlane.xlu1 %1010 }
 0x425   : > { %v1068_v15 = vsel %vm682_vm13, %v1062_v10, %v1011_v14 }
 0x426   : > { %v1075_v16 = vsel %vm1073_vm1, %v1068_v15, %v1047_v29 }
 0x427   : > { %2012 = vrcp.f32 %v1075_v16 }
 0x428   : > { %v921_v17 = vpop.xlane.xlu0 %920  ;;  %v954_v6 = vpop.xlane.xlu1 %953 }
 0x429   : > { %v1063_v35 = vsel %vm1060_vm12, %v912_v58, %v954_v6 }
 0x42c   : > { %v948_v18 = vpop.xlane.xlu0 %947  ;;  %v957_v39 = vpop.xlane.xlu1 %956 }
 0x42d   : > { %v1061_v21 = vsel %vm1060_vm12, %v906_v8, %v948_v18  ;;  %v1064_v23 = vsel %vm1060_vm12, %v915_v9, %v957_v39 }
 0x430   : > { %v1044_v40 = vpop.xlane.xlu0 %1043  ;;  %v1053_v19 = vpop.xlane.xlu1 %1052 }
 0x434   : > { %v2013_v20 = vpop.eup %2012  ;;  %v1008_v24 = vpop.xlane.xlu0 %1007 }
 0x435   : > { %v1017_v56 = vpop.xlane.xlu1 %1016  ;;  %v1067_v57 = vsel %vm682_vm13, %v1061_v21, %v1008_v24  ;;  %v1191_v7 = vmul.f32 %v2013_v20, %v1164_v26  ;;  %v2049_v26 = vld [vmem:[%s2154_s8] sm:$0xff] }
 0x436   : > { %v1070_v5 = vsel %vm682_vm13, %v1064_v23, %v1017_v56  ;;  %v1074_v25 = vsel %vm1073_vm1, %v1067_v57, %v1044_v40 }
 0x437   : > { %v1077_v28 = vsel %vm1073_vm1, %v1070_v5, %v1053_v19  ;;  %2014 = vrcp.f32 %v1074_v25  ;;  %v1201_v31 = vadd.f32 %v2048_v30, %v1191_v7 }
 0x438   : > { %2016 = vrcp.f32 %v1077_v28  ;;  %v1050_v32 = vpop.xlane.xlu0 %1049 }
 0x439   : > { %v960_v33 = vpop.xlane.xlu1 %959  ;;  %v1209_v34 = vsel %vm269_vm0, %v1201_v31, 0.0 }
 0x43a   : > { %1210 = vadd.xlane.f32.xlu1 %v1209_v34  ;;  %v1065_v44 = vsel %vm1060_vm12, %v918_v11, %v960_v33  ;;  %v2053_v11 = vld [vmem:[%s2154_s8 + $0x28] sm:$0xff] }
 0x43c   : > { %v1014_v36 = vpop.xlane.xlu0 %1013 }
 0x43d   : > { %v963_v12 = vpop.xlane.xlu1 %962  ;;  %v1069_v13 = vsel %vm682_vm13, %v1063_v35, %v1014_v36  ;;  %v1308_v36 = vld [vmem:[%s2947_s2 + $0x18] sm:$0xff] }
 0x43e   : > { %v1066_v37 = vsel %vm1060_vm12, %v921_v17, %v963_v12  ;;  %v1076_v38 = vsel %vm1073_vm1, %v1069_v13, %v1050_v32  ;;  %1897 = vmatprep.subr.mxu0 %v1308_v36  ;;  %v1307_v12 = vld [vmem:[%s2947_s2 + $0x10] sm:$0xff]  ;;  %v1306_v13 = vld [vmem:[%s2947_s2 + $0x8] sm:$0xff] }
 0x43f   : > { %2018 = vrcp.f32 %v1076_v38  ;;  %1898 = vmatpush3.msra.mxu0 %v1308_v36 }
 0x440   : > { %v1020_v43 = vpop.xlane.xlu0 %1019  ;;  %1899 = vmatprep.subr.mxu0 %v1307_v12 }
 0x441   : > { %v1071_v46 = vsel %vm682_vm13, %v1065_v44, %v1020_v43  ;;  %1900 = vmatpush3.msra.mxu0 %v1307_v12  ;;  %v1434_v12 = vld [vmem:[%s2948_s3 + $0x10] sm:$0xff] }
 0x442   : > { %1901 = vmatprep.subr.mxu0 %v1306_v13 }
 0x443   : > { %1902 = vmatpush3.msra.mxu0 %v1306_v13 }
 0x444   : > { %v2015_v45 = vpop.eup %2014  ;;  %v1056_v47 = vpop.xlane.xlu0 %1055 }
 0x445   : > { %v2017_v48 = vpop.eup %2016  ;;  %v1078_v49 = vsel %vm1073_vm1, %v1071_v46, %v1056_v47  ;;  %v1189_v50 = vmul.f32 %v2015_v45, %v2701_v51  ;;  %v1447_v47 = vld [vmem:[%s2948_s3 + $0x78] sm:$0xff] }
 0x446   : > { %2020 = vrcp.f32 %v1078_v49  ;;  %v1195_v52 = vmul.f32 %v2017_v48, %v2706_v62 }
 0x447   : > { %v1200_v27 = vadd.f32 %v2049_v26, %v1189_v50 }
 0x448   : > { %v1203_v55 = vadd.f32 %v2050_v53, %v1195_v52 }
 0x449   : > { %v1206_v58 = vsel %vm269_vm0, %v1200_v27, 0.0 }
 0x44a   : > { %1207 = vadd.xlane.f32.xlu0 %v1206_v58  ;;  %v1215_v59 = vsel %vm269_vm0, %v1203_v55, 0.0 }
 0x44b   : > { %1216 = vadd.xlane.f32.xlu1 %v1215_v59 }
 0x44c   : > { %v2019_v60 = vpop.eup %2018 }
 0x44d   : > { %v1193_v61 = vmul.f32 %v2019_v60, %v2703_v54 }
 0x44f   : > { %v1202_v63 = vadd.f32 %v2051_v41, %v1193_v61 }
 0x451   : > { %v1212_v51 = vsel %vm269_vm0, %v1202_v63, 0.0 }
 0x452   : > { %1213 = vadd.xlane.f32.xlu0 %v1212_v51 }
 0x453   : > { %v2021_v62 = vpop.eup %2020 }
 0x454   : > { %v1197_v42 = vmul.f32 %v2021_v62, %v2710_v1 }
 0x456   : > { %v1204_v2 = vadd.f32 %v2052_v0, %v1197_v42  ;;  %v2798_v42 = vld [vmem:[%s2949_s4 + $0x3] ss:$0 sm:$0xff] }
 0x458   : > { %v1218_v4 = vsel %vm269_vm0, %v1204_v2, 0.0 }
 0x459   : > { %1219 = vadd.xlane.f32.xlu0 %v1218_v4 }
 0x477   : > { %v1023_v8 = vpop.xlane.xlu1 %1022 }
 0x478   : > { %v1072_v22 = vsel %vm682_vm13, %v1066_v37, %v1023_v8  ;;  %v1305_v37 = vld [vmem:[%s2947_s2] sm:$0xff] }
 0x479   : > { %1903 = vmatprep.subr.mxu0 %v1305_v37 }
 0x47a   : > { %1904 = vmatpush3.msra.mxu0 %v1305_v37  ;;  %v1433_v37 = vld [vmem:[%s2948_s3 + $0x8] sm:$0xff] }
 0x47b   : > { %v1059_v9 = vpop.xlane.xlu1 %1058  ;;  %1914 = vmatprep.subr.mxu0 %v1447_v47 }
 0x47c   : > { %v1079_v54 = vsel %vm1073_vm1, %v1072_v22, %v1059_v9  ;;  %v2805_v9 = vld [vmem:[%s2949_s4 + $0x4] ss:$0 sm:$0xff] }
 0x47d   : > { %2022 = vrcp.f32 %v1079_v54 }
 0x48a   : > { %v2023_v29 = vpop.eup %2022 }
 0x48b   : > { %v1199_v10 = vmul.f32 %v2023_v29, %v2712_v3 }
 0x48d   : > { %v1205_v14 = vadd.f32 %v2053_v11, %v1199_v10 }
 0x48f   : > { %v1221_v15 = vsel %vm269_vm0, %v1205_v14, 0.0 }
 0x490   : > { %1222 = vadd.xlane.f32.xlu1 %v1221_v15 }
 0x4c3   : > { %v1211_v1 = vpop.xlane.xlu1 %1210 }
 0x4c4   : > { %v1226_v16 = vmul.f32 0.03125, %v1211_v1 }
 0x4c6   : > { %v2749_v17 = vsub.f32 %v1201_v31, %v1226_v16  ;;  %v1445_v16 = vld [vmem:[%s2948_s3 + $0x68] sm:$0xff] }
 0x4c8   : > { %v1238_v6 = vmul.f32 %v2749_v17, %v2749_v17 }
 0x4ca   : > { %v1246_v18 = vsel %vm269_vm0, %v1238_v6, 0.0 }
 0x4cb   : > { %1247 = vadd.xlane.f32.xlu1 %v1246_v18  ;;  %v1444_v18 = vld [vmem:[%s2948_s3 + $0x60] sm:$0xff] }
 0x4d3   : > { %v1208_v39 = vpop.xlane.xlu0 %1207 }
 0x4d4   : > { %v1225_v40 = vmul.f32 0.03125, %v1208_v39  ;;  %v1217_v19 = vpop.xlane.xlu1 %1216 }
 0x4d5   : > { %v1228_v20 = vmul.f32 0.03125, %v1217_v19 }
 0x4d6   : > { %v2754_v3 = vsub.f32 %v1200_v27, %v1225_v40  ;;  %v1443_v40 = vld [vmem:[%s2948_s3 + $0x58] sm:$0xff] }
 0x4d7   : > { %v2756_v21 = vsub.f32 %v1203_v55, %v1228_v20 }
 0x4d8   : > { %v1237_v23 = vmul.f32 %v2754_v3, %v2754_v3 }
 0x4d9   : > { %v1240_v24 = vmul.f32 %v2756_v21, %v2756_v21 }
 0x4da   : > { %v1243_v56 = vsel %vm269_vm0, %v1237_v23, 0.0  ;;  %v1441_v23 = vld [vmem:[%s2948_s3 + $0x48] sm:$0xff] }
 0x4db   : > { %v1214_v57 = vpop.xlane.xlu0 %1213  ;;  %1244 = vadd.xlane.f32.xlu0 %v1243_v56  ;;  %v1252_v5 = vsel %vm269_vm0, %v1240_v24, 0.0  ;;  %v1440_v56 = vld [vmem:[%s2948_s3 + $0x40] sm:$0xff] }
 0x4dc   : > { %v1227_v7 = vmul.f32 0.03125, %v1214_v57  ;;  %1253 = vadd.xlane.f32.xlu1 %v1252_v5  ;;  %v1439_v5 = vld [vmem:[%s2948_s3 + $0x38] sm:$0xff] }
 0x4de   : > { %v2764_v25 = vsub.f32 %v1202_v63, %v1227_v7  ;;  %v1438_v7 = vld [vmem:[%s2948_s3 + $0x30] sm:$0xff] }
 0x4e0   : > { %v1239_v28 = vmul.f32 %v2764_v25, %v2764_v25 }
 0x4e2   : > { %v1220_v30 = vpop.xlane.xlu0 %1219  ;;  %v1249_v31 = vsel %vm269_vm0, %v1239_v28, 0.0  ;;  %v1436_v28 = vld [vmem:[%s2948_s3 + $0x20] sm:$0xff] }
 0x4e3   : > { %v1229_v32 = vmul.f32 0.03125, %v1220_v30  ;;  %1250 = vadd.xlane.f32.xlu0 %v1249_v31 }
 0x4e5   : > { %v2769_v33 = vsub.f32 %v1204_v2, %v1229_v32 }
 0x4e7   : > { %v1241_v34 = vmul.f32 %v2769_v33, %v2769_v33 }
 0x4e9   : > { %v1255_v35 = vsel %vm269_vm0, %v1241_v34, 0.0 }
 0x4ea   : > { %1256 = vadd.xlane.f32.xlu0 %v1255_v35  ;;  %v1435_v35 = vld [vmem:[%s2948_s3 + $0x18] sm:$0xff] }
 0x519   : > { %v1223_v38 = vpop.xlane.xlu1 %1222 }
 0x51a   : > { %v1230_v43 = vmul.f32 0.03125, %v1223_v38  ;;  %v1432_v38 = vld [vmem:[%s2948_s3] sm:$0xff] }
 0x51c   : > { %v2786_v44 = vsub.f32 %v1205_v14, %v1230_v43  ;;  %v1446_v14 = vld [vmem:[%s2948_s3 + $0x70] sm:$0xff]  ;;  %v1826_v43 = vld [vmem:[%s2949_s4 + $0x1] ss:$0 sm:$0xff] }
 0x51e   : > { %v1242_v45 = vmul.f32 %v2786_v44, %v2786_v44 }
 0x520   : > { %v1258_v46 = vsel %vm269_vm0, %v1242_v45, 0.0 }
 0x521   : > { %1259 = vadd.xlane.f32.xlu1 %v1258_v46 }
 0x554   : > { %v1248_v48 = vpop.xlane.xlu1 %1247 }
 0x555   : > { %v1262_v49 = vmul.f32 0.03125, %v1248_v48 }
 0x557   : > { %v1268_v50 = vadd.f32 1e-05, %v1262_v49 }
 0x559   : > { %2024 = vrsqrt.f32 %v1268_v50 }
 0x564   : > { %v1245_v52 = vpop.xlane.xlu0 %1244 }
 0x565   : > { %v1261_v26 = vmul.f32 0.03125, %v1245_v52  ;;  %v1254_v27 = vpop.xlane.xlu1 %1253 }
 0x566   : > { %v1264_v53 = vmul.f32 0.03125, %v1254_v27  ;;  %v2025_v41 = vpop.eup %2024 }
 0x567   : > { %v1267_v55 = vadd.f32 1e-05, %v1261_v26  ;;  %v1280_v51 = vmul.f32 %v2025_v41, %v2749_v17 }
 0x568   : > { %v1270_v58 = vadd.f32 1e-05, %v1264_v53 }
 0x569   : > { %2026 = vrsqrt.f32 %v1267_v55  ;;  %v1290_v8 = vmul.f32 %v2798_v42, %v1280_v51  ;;  %v1833_v51 = vld [vmem:[%s2949_s4 + $0x2] ss:$0 sm:$0xff] }
 0x56a   : > { %2028 = vrsqrt.f32 %v1270_v58 }
 0x56b   : > { %v2812_v10 = vadd.f32 %v2805_v9, %v1290_v8 }
 0x56c   : > { %v1251_v59 = vpop.xlane.xlu0 %1250 }
 0x56d   : > { %v1263_v60 = vmul.f32 0.03125, %v1251_v59 }
 0x56f   : > { %v1269_v61 = vadd.f32 1e-05, %v1263_v60 }
 0x571   : > { %2030 = vrsqrt.f32 %v1269_v61 }
 0x573   : > { %v1257_v63 = vpop.xlane.xlu0 %1256 }
 0x574   : > { %v1265_v62 = vmul.f32 0.03125, %v1257_v63 }
 0x576   : > { %v2027_v0 = vpop.eup %2026  ;;  %v1271_v2 = vadd.f32 1e-05, %v1265_v62 }
 0x577   : > { %v1279_v4 = vmul.f32 %v2027_v0, %v2754_v3  ;;  %v2029_v22 = vpop.eup %2028  ;;  %v1442_v3 = vld [vmem:[%s2948_s3 + $0x50] sm:$0xff] }
 0x578   : > { %2032 = vrsqrt.f32 %v1271_v2  ;;  %v1282_v11 = vmul.f32 %v2029_v22, %v2756_v21 }
 0x579   : > { %v1289_v54 = vmul.f32 %v2798_v42, %v1279_v4 }
 0x57a   : > { %v1292_v17 = vmul.f32 %v2798_v42, %v1282_v11 }
 0x57b   : > { %v2809_v29 = vadd.f32 %v2805_v9, %v1289_v54 }
 0x57c   : > { %v2838_v19 = vadd.f32 %v2805_v9, %v1292_v17 }
 0x57d   : > { %1905 = vmatprep.mubr.msk.f32.mxu0 %vm269_vm0, %v2809_v29 }
 0x57e   : > { %v2031_v15 = vpop.eup %2030  ;;  %1906 = vmatmul.mubr.msk.f32.vlgmr.msra.gmra.mxu0 %vm269_vm0, %v2812_v10 }
 0x57f   : > { %v1281_v1 = vmul.f32 %v2031_v15, %v2764_v25  ;;  %1915 = vmatpush3.msra.mxu0 %v1447_v47  ;;  %v1437_v25 = vld [vmem:[%s2948_s3 + $0x28] sm:$0xff] }
 0x580   : > { %1916 = vmatprep.subr.mxu0 %v1446_v14 }
 0x581   : > { %v1291_v6 = vmul.f32 %v2798_v42, %v1281_v1  ;;  %1917 = vmatpush3.msra.mxu0 %v1446_v14 }
 0x582   : > { %1918 = vmatprep.subr.mxu0 %v1445_v16 }
 0x583   : > { %v2832_v39 = vadd.f32 %v2805_v9, %v1291_v6  ;;  %1919 = vmatpush3.msra.mxu0 %v1445_v16 }
 0x584   : > { %1920 = vmatprep.subr.mxu0 %v1444_v18 }
 0x585   : > { %v2033_v20 = vpop.eup %2032  ;;  %1908 = vmatprep.mubr.msk.f32.mxu0 %vm269_vm0, %v2832_v39  ;;  %1921 = vmatpush3.msra.mxu0 %v1444_v18 }
 0x586   : > { %1909 = vmatmul.mubr.msk.f32.gmra.mxu0 %vm269_vm0, %v2838_v19  ;;  %v1283_v21 = vmul.f32 %v2033_v20, %v2769_v33  ;;  %1922 = vmatprep.subr.mxu0 %v1443_v40 }
 0x587   : > { %1923 = vmatpush3.msra.mxu0 %v1443_v40 }
 0x588   : > { %v1293_v24 = vmul.f32 %v2798_v42, %v1283_v21  ;;  %1924 = vmatprep.subr.mxu0 %v1442_v3 }
 0x589   : > { %1925 = vmatpush3.msra.mxu0 %v1442_v3 }
 0x58a   : > { %v2856_v57 = vadd.f32 %v2805_v9, %v1293_v24  ;;  %1926 = vmatprep.subr.mxu0 %v1441_v23 }
 0x58b   : > { %1927 = vmatpush3.msra.mxu0 %v1441_v23 }
 0x58c   : > { %1911 = vmatprep.mubr.msk.f32.mxu0 %vm269_vm0, %v2856_v57  ;;  %1928 = vmatprep.subr.mxu0 %v1440_v56 }
 0x58d   : > { %1929 = vmatpush3.msra.mxu0 %v1440_v56 }
 0x58e   : > { %1930 = vmatprep.subr.mxu0 %v1439_v5 }
 0x58f   : > { %1931 = vmatpush3.msra.mxu0 %v1439_v5 }
 0x590   : > { %1932 = vmatprep.subr.mxu0 %v1438_v7 }
 0x591   : > { %1933 = vmatpush3.msra.mxu0 %v1438_v7 }
 0x592   : > { %1934 = vmatprep.subr.mxu0 %v1437_v25 }
 0x593   : > { %1935 = vmatpush3.msra.mxu0 %v1437_v25 }
 0x594   : > { %1936 = vmatprep.subr.mxu0 %v1436_v28 }
 0x595   : > { %1937 = vmatpush3.msra.mxu0 %v1436_v28 }
 0x596   : > { %1938 = vmatprep.subr.mxu0 %v1435_v35 }
 0x597   : > { %1939 = vmatpush3.msra.mxu0 %v1435_v35 }
 0x598   : > { %1940 = vmatprep.subr.mxu0 %v1434_v12 }
 0x599   : > { %1941 = vmatpush3.msra.mxu0 %v1434_v12 }
 0x59a   : > { %1942 = vmatprep.subr.mxu0 %v1433_v37 }
 0x59b   : > { %1943 = vmatpush3.msra.mxu0 %v1433_v37 }
 0x59c   : > { %1944 = vmatprep.subr.mxu0 %v1432_v38 }
 0x59d   : > { %1945 = vmatpush3.msra.mxu0 %v1432_v38 }
 0x5aa   : > { %v1260_v30 = vpop.xlane.xlu1 %1259 }
 0x5ab   : > { %v1266_v31 = vmul.f32 0.03125, %v1260_v30 }
 0x5ad   : > { %v1272_v32 = vadd.f32 1e-05, %v1266_v31 }
 0x5af   : > { %2034 = vrsqrt.f32 %v1272_v32 }
 0x5bc   : > { %v2035_v33 = vpop.eup %2034 }
 0x5bd   : > { %v1284_v34 = vmul.f32 %v2035_v33, %v2786_v44 }
 0x5bf   : > { %v1294_v36 = vmul.f32 %v2798_v42, %v1284_v34 }
 0x5c1   : > { %v1304_v13 = vadd.f32 %v2805_v9, %v1294_v36 }
 0x5c3   : > { %1912 = vmatmul.mubr.msk.f32.gmra.mxu0 %vm269_vm0, %v1304_v13 }
 0x63e   : > { %v1907_v44 = vpop.f32.mrf.mxu0 }
 0x63f   : > { %v1403_v45 = vadd.f32 %v1907_v44, %v1826_v43 }
 0x640   : > { %v1397_v46 = vpop.f32.mrf.mxu0 }
 0x641   : > { %v1398_v47 = vadd.f32 %v1826_v43, %v1397_v46  ;;  %v1427_v49 = vmax.f32 %v1403_v45, 0.0 }
 0x643   : > { %v1426_v48 = vmax.f32 %v1398_v47, 0.0 }
 0x645   : > { %1946 = vmatprep.mubr.f32.mxu0 %v1426_v48 }
 0x646   : > { %v1910_v50 = vpop.f32.mrf.mxu0  ;;  %1947 = vmatmul.mubr.f32.vlgmr.msra.gmra.mxu0 %v1427_v49 }
 0x647   : > { %v1413_v52 = vadd.f32 %v1910_v50, %v1826_v43 }
 0x648   : > { %v1407_v26 = vpop.f32.mrf.mxu0 }
 0x649   : > { %v1408_v27 = vadd.f32 %v1826_v43, %v1407_v26  ;;  %v1429_v55 = vmax.f32 %v1413_v52, 0.0 }
 0x64b   : > { %v1428_v53 = vmax.f32 %v1408_v27, 0.0 }
 0x64d   : > { %1949 = vmatprep.mubr.f32.mxu0 %v1428_v53 }
 0x64e   : > { %1950 = vmatmul.mubr.f32.gmra.mxu0 %v1429_v55 }
 0x683   : > { %v1913_v58 = vpop.f32.mrf.mxu0 }
 0x684   : > { %v1423_v59 = vadd.f32 %v1913_v58, %v1826_v43 }
 0x685   : > { %v1417_v60 = vpop.f32.mrf.mxu0 }
 0x686   : > { %v1418_v61 = vadd.f32 %v1826_v43, %v1417_v60  ;;  %v1431_v63 = vmax.f32 %v1423_v59, 0.0 }
 0x688   : > { %v1430_v41 = vmax.f32 %v1418_v61, 0.0 }
 0x68a   : > { %1952 = vmatprep.mubr.f32.mxu0 %v1430_v41 }
 0x68b   : > { %1953 = vmatmul.mubr.f32.gmra.mxu0 %v1431_v63 }
 0x706   : > { %v1948_v62 = vpop.f32.mrf.mxu0 }
 0x707   : > { %v1524_v42 = vadd.f32 %v1948_v62, %v1833_v51 }
 0x708   : > { %v1518_v0 = vpop.f32.mrf.mxu0 }
 0x709   : > { %v1548_v2 = vadd.f32 %v1524_v42, %v2812_v10  ;;  %v1519_v4 = vadd.f32 %v1833_v51, %v1518_v0 }
 0x70b   : > { %v1547_v8 = vadd.f32 %v1519_v4, %v2809_v29  ;;  %v1556_v22 = vsel %vm269_vm0, %v1548_v2, 0.0 }
 0x70c   : > { %1557 = vadd.xlane.f32.xlu1 %v1556_v22  ;;  %v1835_v22 = vld [vmem:[%s2949_s4 + $0x6] ss:$0 sm:$0xff] }
 0x70d   : > { %v1553_v9 = vsel %vm269_vm0, %v1547_v8, 0.0 }
 0x70e   : > { %v1951_v54 = vpop.f32.mrf.mxu0  ;;  %1554 = vadd.xlane.f32.xlu0 %v1553_v9 }
 0x70f   : > { %v1534_v11 = vadd.f32 %v1951_v54, %v1833_v51 }
 0x710   : > { %v1528_v14 = vpop.f32.mrf.mxu0 }
 0x711   : > { %v1550_v15 = vadd.f32 %v1534_v11, %v2838_v19  ;;  %v1529_v1 = vadd.f32 %v1833_v51, %v1528_v14 }
 0x713   : > { %v1549_v16 = vadd.f32 %v1529_v1, %v2832_v39  ;;  %v1562_v17 = vsel %vm269_vm0, %v1550_v15, 0.0 }
 0x714   : > { %1563 = vadd.xlane.f32.xlu1 %v1562_v17 }
 0x715   : > { %v1559_v10 = vsel %vm269_vm0, %v1549_v16, 0.0 }
 0x716   : > { %1560 = vadd.xlane.f32.xlu0 %v1559_v10 }
 0x74b   : > { %v1954_v29 = vpop.f32.mrf.mxu0 }
 0x74c   : > { %v1544_v6 = vadd.f32 %v1954_v29, %v1833_v51 }
 0x74d   : > { %v1538_v18 = vpop.f32.mrf.mxu0 }
 0x74e   : > { %v1552_v40 = vadd.f32 %v1544_v6, %v1304_v13  ;;  %v1539_v20 = vadd.f32 %v1833_v51, %v1538_v18 }
 0x750   : > { %v1551_v3 = vadd.f32 %v1539_v20, %v2856_v57  ;;  %v1568_v21 = vsel %vm269_vm0, %v1552_v40, 0.0 }
 0x751   : > { %1569 = vadd.xlane.f32.xlu1 %v1568_v21 }
 0x752   : > { %v1565_v19 = vsel %vm269_vm0, %v1551_v3, 0.0 }
 0x753   : > { %1566 = vadd.xlane.f32.xlu0 %v1565_v19 }
 0x795   : > { %v1558_v39 = vpop.xlane.xlu1 %1557 }
 0x796   : > { %v1572_v23 = vmul.f32 0.03125, %v1558_v39 }
 0x797   : > { %v1555_v24 = vpop.xlane.xlu0 %1554 }
 0x798   : > { %v1578_v56 = vsub.f32 %v1548_v2, %v1572_v23  ;;  %v1571_v5 = vmul.f32 0.03125, %v1555_v24  ;;  %v1834_v2 = vld [vmem:[%s2949_s4 + $0x5] ss:$0 sm:$0xff] }
 0x79a   : > { %v1577_v7 = vsub.f32 %v1547_v8, %v1571_v5  ;;  %v1584_v25 = vmul.f32 %v1578_v56, %v1578_v56 }
 0x79c   : > { %v1592_v28 = vsel %vm269_vm0, %v1584_v25, 0.0  ;;  %v1583_v30 = vmul.f32 %v1577_v7, %v1577_v7 }
 0x79d   : > { %v1564_v31 = vpop.xlane.xlu1 %1563  ;;  %1593 = vadd.xlane.f32.xlu1 %v1592_v28 }
 0x79e   : > { %v1574_v32 = vmul.f32 0.03125, %v1564_v31  ;;  %v1589_v57 = vsel %vm269_vm0, %v1583_v30, 0.0 }
 0x79f   : > { %v1561_v33 = vpop.xlane.xlu0 %1560  ;;  %1590 = vadd.xlane.f32.xlu0 %v1589_v57 }
 0x7a0   : > { %v1580_v34 = vsub.f32 %v1550_v15, %v1574_v32  ;;  %v1573_v35 = vmul.f32 0.03125, %v1561_v33 }
 0x7a2   : > { %v1579_v36 = vsub.f32 %v1549_v16, %v1573_v35  ;;  %v1586_v12 = vmul.f32 %v1580_v34, %v1580_v34 }
 0x7a4   : > { %v1598_v13 = vsel %vm269_vm0, %v1586_v12, 0.0  ;;  %v1585_v37 = vmul.f32 %v1579_v36, %v1579_v36 }
 0x7a5   : > { %1599 = vadd.xlane.f32.xlu1 %v1598_v13 }
 0x7a6   : > { %v1595_v38 = vsel %vm269_vm0, %v1585_v37, 0.0 }
 0x7a7   : > { %1596 = vadd.xlane.f32.xlu0 %v1595_v38 }
 0x7da   : > { %v1570_v43 = vpop.xlane.xlu1 %1569 }
 0x7db   : > { %v1576_v44 = vmul.f32 0.03125, %v1570_v43 }
 0x7dc   : > { %v1567_v45 = vpop.xlane.xlu0 %1566 }
 0x7dd   : > { %v1582_v46 = vsub.f32 %v1552_v40, %v1576_v44  ;;  %v1575_v47 = vmul.f32 0.03125, %v1567_v45 }
 0x7df   : > { %v1581_v48 = vsub.f32 %v1551_v3, %v1575_v47  ;;  %v1588_v49 = vmul.f32 %v1582_v46, %v1582_v46 }
 0x7e1   : > { %v1604_v50 = vsel %vm269_vm0, %v1588_v49, 0.0  ;;  %v1587_v52 = vmul.f32 %v1581_v48, %v1581_v48 }
 0x7e2   : > { %1605 = vadd.xlane.f32.xlu1 %v1604_v50 }
 0x7e3   : > { %v1601_v26 = vsel %vm269_vm0, %v1587_v52, 0.0 }
 0x7e4   : > { %1602 = vadd.xlane.f32.xlu0 %v1601_v26 }
 0x826   : > { %v1594_v27 = vpop.xlane.xlu1 %1593 }
 0x827   : > { %v1608_v53 = vmul.f32 0.03125, %v1594_v27 }
 0x828   : > { %v1591_v55 = vpop.xlane.xlu0 %1590 }
 0x829   : > { %v1614_v58 = vadd.f32 1e-05, %v1608_v53  ;;  %v1607_v59 = vmul.f32 0.03125, %v1591_v55 }
 0x82b   : > { %2036 = vrsqrt.f32 %v1614_v58  ;;  %v1613_v60 = vadd.f32 1e-05, %v1607_v59 }
 0x82d   : > { %2038 = vrsqrt.f32 %v1613_v60 }
 0x82e   : > { %v1600_v61 = vpop.xlane.xlu1 %1599 }
 0x82f   : > { %v1610_v41 = vmul.f32 0.03125, %v1600_v61 }
 0x830   : > { %v1597_v63 = vpop.xlane.xlu0 %1596 }
 0x831   : > { %v1616_v51 = vadd.f32 1e-05, %v1610_v41  ;;  %v1609_v62 = vmul.f32 0.03125, %v1597_v63 }
 0x833   : > { %2040 = vrsqrt.f32 %v1616_v51  ;;  %v1615_v42 = vadd.f32 1e-05, %v1609_v62 }
 0x835   : > { %2042 = vrsqrt.f32 %v1615_v42 }
 0x838   : > { %v2037_v0 = vpop.eup %2036 }
 0x839   : > { %v1626_v4 = vmul.f32 %v2037_v0, %v1578_v56 }
 0x83a   : > { %v2039_v8 = vpop.eup %2038 }
 0x83b   : > { %v1636_v9 = vmul.f32 %v1834_v2, %v1626_v4  ;;  %v1625_v54 = vmul.f32 %v2039_v8, %v1577_v7 }
 0x83d   : > { %v1646_v11 = vadd.f32 %v1835_v22, %v1636_v9  ;;  %v1635_v14 = vmul.f32 %v1834_v2, %v1625_v54 }
 0x83f   : > { %1652 = vst.msk [vmem:[%s2922_s12 + $0x8] sm:$0xff] %vm269_vm0, %v1646_v11  ;;  %v1645_v15 = vadd.f32 %v1835_v22, %v1635_v14 }
 0x840   : > { %v2041_v1 = vpop.eup %2040 }
 0x841   : > { %1651 = vst.msk [vmem:[%s2922_s12] sm:$0xff] %vm269_vm0, %v1645_v15  ;;  %v1628_v16 = vmul.f32 %v2041_v1, %v1580_v34 }
 0x842   : > { %v2043_v17 = vpop.eup %2042 }
 0x843   : > { %v1638_v10 = vmul.f32 %v1834_v2, %v1628_v16  ;;  %v1627_v29 = vmul.f32 %v2043_v17, %v1579_v36 }
 0x845   : > { %v1648_v6 = vadd.f32 %v1835_v22, %v1638_v10  ;;  %v1637_v18 = vmul.f32 %v1834_v2, %v1627_v29 }
 0x847   : > { %1654 = vst.msk [vmem:[%s2922_s12 + $0x18] sm:$0xff] %vm269_vm0, %v1648_v6  ;;  %v1647_v40 = vadd.f32 %v1835_v22, %v1637_v18 }
 0x849   : > { %1653 = vst.msk [vmem:[%s2922_s12 + $0x10] sm:$0xff] %vm269_vm0, %v1647_v40 }
 0x86b   : > { %v1606_v20 = vpop.xlane.xlu1 %1605 }
 0x86c   : > { %v1612_v3 = vmul.f32 0.03125, %v1606_v20 }
 0x86d   : > { %v1603_v21 = vpop.xlane.xlu0 %1602 }
 0x86e   : > { %v1618_v19 = vadd.f32 1e-05, %v1612_v3  ;;  %v1611_v39 = vmul.f32 0.03125, %v1603_v21 }
 0x870   : > { %2044 = vrsqrt.f32 %v1618_v19  ;;  %v1617_v23 = vadd.f32 1e-05, %v1611_v39 }
 0x872   : > { %2046 = vrsqrt.f32 %v1617_v23 }
 0x87d   : > { %v2045_v24 = vpop.eup %2044 }
 0x87e   : > { %v1630_v56 = vmul.f32 %v2045_v24, %v1582_v46 }
 0x87f   : > { %v2047_v5 = vpop.eup %2046 }
 0x880   : > { %v1640_v7 = vmul.f32 %v1834_v2, %v1630_v56  ;;  %v1629_v25 = vmul.f32 %v2047_v5, %v1581_v48 }
 0x882   : > { %v1650_v28 = vadd.f32 %v1835_v22, %v1640_v7  ;;  %v1639_v30 = vmul.f32 %v1834_v2, %v1629_v25 }
 0x884   : > { %1656 = vst.msk [vmem:[%s2922_s12 + $0x28] sm:$0xff] %vm269_vm0, %v1650_v28  ;;  %v1649_v31 = vadd.f32 %v1835_v22, %v1639_v30 }
 0x886   : > { %1655 = vst.msk [vmem:[%s2922_s12 + $0x20] sm:$0xff] %vm269_vm0, %v1649_v31 }
 0x887 PF: > { %s15_s20 = sadd.s32 1, %s2076_s20   ;;  %s2957_s18 = smov %s2072_s19 }
 0x888   : > { %p12_p5 = scmp.ge.s32.totalorder %s15_s20, 4   ;;  %s2958_s19 = smov %s2960_s21 }
 0x88a   :  { %14 = sbr.rel (!%p12_p5) target bundleno = 2 (0x2), region = 70 }

</bundles_post_ra>
